<compile_context>
chip_gen: v6e
topology: v6e:2x2x1
jax: 0.10.0
libtpu: 0.0.40
codegen_flags: <defaults>
</compile_context>

<pallas_src>
import functools

import jax
import jax.numpy as jnp
import numpy as np
from jax.experimental import pallas as pl
from jax.experimental.pallas import tpu as pltpu


def _sparse_attention_kernel(
    x_ref,        # (1, S, D)
    wqkv_ref,     # (D, 3*H*Dh)  compute-dtype; 1/sqrt(Dh) folded into q cols
    bqkv_ref,     # (1, 3*H*Dh)  f32; 1/sqrt(Dh) folded into q slice
    wproj_ref,    # (H*Dh, D)    compute-dtype (proj weight, pre-transposed)
    bproj_ref,    # (1, D)       f32
    zn_ref,       # (H, Dh)      f32, lane-dense node gate logits
    zh_ref,       # (H, Dh)      f32, per-head gate logit broadcast over Dh
    zl_ref,       # (1, 1)       f32, layer gate logit
    o_ref,        # (1, S, D)
    *,
    num_heads: int,
    head_size: int,
    prune_node: bool,
    prune_head: bool,
    prune_layer: bool,
    approx_recip: bool,
):
    H, Dh = num_heads, head_size
    S = x_ref.shape[1]
    cd = wqkv_ref.dtype                                        # compute dtype

    x = x_ref[0].astype(cd)                                     # (S, D)

    # --- QKV projection: one big MXU matmul (weights already in compute dtype,
    #     attention scale pre-folded into the q columns) ----------------------
    qkv = jnp.dot(x, wqkv_ref[...], preferred_element_type=jnp.float32)
    qkv = qkv + bqkv_ref[0]                                     # (S, 3*H*Dh) f32

    # --- single head-major relayout: (S, 3H, Dh) -> (3H, S, Dh) --------------
    # NOTE: Dh should be a multiple of the f32 sublane tile (8) for a cheap
    # relayout (true for ViT configs).
    qkv_h = jnp.swapaxes(qkv.reshape(S, 3 * H, Dh), 0, 1)       # (3H, S, Dh)
    q = qkv_h[:H]                                               # (H, S, Dh)
    k = qkv_h[H:2 * H]                                          # (H, S, Dh)
    v = qkv_h[2 * H:]                                           # (H, S, Dh)

    if prune_node:
        g = jax.nn.sigmoid(zn_ref[...])[:, None, :]             # (H, 1, Dh)
        q = q * g
        k = k * g
        v = v * g
    if prune_head:
        # head_gate * (attn @ v_h) == attn @ (head_gate * v_h): fold into V.
        v = v * jax.nn.sigmoid(zh_ref[...])[:, None, :]         # (H, 1, Dh)

    # --- batched-over-heads attention (flash-style NT contractions) ----------
    scores = jnp.einsum('hqd,hkd->hqk', q.astype(cd), k.astype(cd),
                        preferred_element_type=jnp.float32)     # (H, S, S)
    scores = scores - jnp.max(scores, axis=-1, keepdims=True)
    p = jnp.exp(scores)
    l = jnp.sum(p, axis=-1, keepdims=True)                      # (H, S, 1)

    # PV with un-normalized probabilities; normalize the small (H,S,Dh) result
    # instead of the (H,S,S) probabilities.  approx=True -> EUP slot.
    ctx = jnp.einsum('hqk,hkd->hqd', p.astype(cd), v.astype(cd),
                     preferred_element_type=jnp.float32)        # (H, S, Dh)
    ctx = ctx * pl.reciprocal(l, approx=approx_recip)

    # --- output projection: single (S, H*Dh) @ (H*Dh, D) matmul --------------
    ctx_s = jnp.swapaxes(ctx, 0, 1).reshape(S, H * Dh)          # (S, H*Dh)
    y = jnp.dot(ctx_s.astype(cd), wproj_ref[...],
                preferred_element_type=jnp.float32) + bproj_ref[0]   # (S, D)

    if prune_layer:
        y = y * jax.nn.sigmoid(zl_ref[...])                     # (1,1) broadcast

    o_ref[0] = y.astype(o_ref.dtype)                            # lane-dense (S, D)


def prepare_params(wqkv, bqkv, wproj, bproj, zeta_node, zeta_head, zeta_layer,
                   *, num_heads, head_size, scale=None,
                   prune_node=False, prune_head=False, prune_layer=False,
                   compute_dtype=jnp.bfloat16):
    """Convert PyTorch-layout parameters to the kernel layout ONCE.

    wqkv: (3*H*Dh, D)   bqkv: (3*H*Dh,)   wproj: (D, H*Dh)   bproj: (D,)
    zeta_node: H*Dh elems (torch: (1,1,H,1,Dh)) or None
    zeta_head: H elems    (torch: (1,1,H,1))    or None
    zeta_layer: 1 elem    (torch: (1,))         or None
    Weights are stored in compute_dtype (bf16 = native MXU input format);
    biases / gates stay f32 (applied to f32 accumulators).
    """
    H, Dh = num_heads, head_size
    hd = H * Dh
    D = wqkv.shape[1]
    if scale is None:
        scale = head_size ** -0.5

    # A prune_* flag with a missing zeta would silently gate by sigmoid(const).
    if prune_node:
        assert zeta_node is not None, "prune_node=True requires zeta_node"
    if prune_head:
        assert zeta_head is not None, "prune_head=True requires zeta_head"
    if prune_layer:
        assert zeta_layer is not None, "prune_layer=True requires zeta_layer"

    # Fold 1/sqrt(Dh) into the q projection weight/bias (free, done offline).
    col_scale = jnp.concatenate([jnp.full((hd,), scale, jnp.float32),
                                 jnp.ones((2 * hd,), jnp.float32)])
    wqkv_t = (jnp.asarray(wqkv, jnp.float32).T
              * col_scale[None, :]).astype(compute_dtype)        # (D, 3*hd)
    bqkv2 = (jnp.asarray(bqkv, jnp.float32) * col_scale).reshape(1, 3 * hd)

    wproj_t = jnp.asarray(wproj, jnp.float32).T.astype(compute_dtype)  # (hd, D)
    bproj2 = jnp.asarray(bproj, jnp.float32).reshape(1, D)

    # Lane-dense gate logits (unused placeholders when the flag is off — the
    # corresponding branch is compiled out of the kernel).
    zn = (jnp.ones((H, Dh), jnp.float32) if zeta_node is None
          else jnp.asarray(zeta_node, jnp.float32).reshape(H, Dh))
    zh = (jnp.ones((H, Dh), jnp.float32) if zeta_head is None
          else jnp.broadcast_to(
              jnp.asarray(zeta_head, jnp.float32).reshape(H, 1), (H, Dh)))
    zh = jnp.asarray(zh)
    zl = (jnp.ones((1, 1), jnp.float32) if zeta_layer is None
          else jnp.asarray(zeta_layer, jnp.float32).reshape(1, 1))

    return (wqkv_t, bqkv2, wproj_t, bproj2, zn, zh, zl)


def sparse_attention(x, params, *, num_heads, head_size,
                     prune_node=False, prune_head=False, prune_layer=False,
                     single_buffer_weights=True):
    wqkv_t, bqkv2, wproj_t, bproj2, zn, zh, zl = params
    B, S, D = x.shape
    H, Dh = num_heads, head_size
    hd = H * Dh
    compute_dtype = wqkv_t.dtype
    approx_recip = compute_dtype != jnp.float32   # exact recip on the f32 path

    kernel = functools.partial(
        _sparse_attention_kernel,
        num_heads=H, head_size=Dh,
        prune_node=prune_node, prune_head=prune_head, prune_layer=prune_layer,
        approx_recip=approx_recip,
    )

    # Raise the scoped-VMEM limit only when the estimated per-step working set
    # exceeds the ~32 MiB default (ViT-Base scale); leave the default otherwise.
    w_item = jnp.dtype(compute_dtype).itemsize
    est_bytes = (
        (D * 3 * hd + hd * D) * w_item                     # weights (1 copy)
        + (3 * hd + D + 2 * H * Dh + 1) * 4                # biases + zetas
        + 2 * 2 * S * D * x.dtype.itemsize                 # x + out, dbl-buffered
        + (S * 3 * hd + 3 * H * S * Dh                     # qkv + q/k/v
           + 2 * H * S * S                                 # scores + p
           + H * S * Dh + S * hd + S * D) * 4)             # ctx + ctx_s + y
    vmem_limit = None
    if est_bytes > 32 * 1024 * 1024:
        vmem_limit = min(int(est_bytes * 1.25), 128 * 1024 * 1024)

    def build(sb_weights):
        def const_spec(shape):
            ndim = len(shape)
            idx = lambda b: (0,) * ndim
            if sb_weights:
                # Grid-invariant: single-buffer to halve weight VMEM residency.
                return pl.BlockSpec(shape, idx, pipeline_mode=pl.Buffered(1))
            return pl.BlockSpec(shape, idx)

        return pl.pallas_call(
            kernel,
            out_shape=jax.ShapeDtypeStruct((B, S, D), x.dtype),
            grid=(B,),
            in_specs=[
                pl.BlockSpec((1, S, D), lambda b: (b, 0, 0)),   # x
                const_spec((D, 3 * hd)),                        # qkv weight^T
                const_spec((1, 3 * hd)),                        # qkv bias
                const_spec((hd, D)),                            # proj weight^T
                const_spec((1, D)),                             # proj bias
                const_spec((H, Dh)),                            # zeta_node
                const_spec((H, Dh)),                            # zeta_head
                const_spec((1, 1)),                             # zeta_layer
            ],
            out_specs=pl.BlockSpec((1, S, D), lambda b: (b, 0, 0)),
            compiler_params=pltpu.CompilerParams(
                dimension_semantics=("parallel",),
                vmem_limit_bytes=vmem_limit),
        )

    args = (x, wqkv_t, bqkv2, wproj_t, bproj2, zn, zh, zl)
    if single_buffer_weights:
        try:
            out = build(True)(*args)
            jax.block_until_ready(out)   # surface any runtime issue here
            return out
        except Exception:
            # TODO(synk): pl.Buffered(1) single-buffering of grid-invariant
            # inputs not supported by this JAX version; fall back to the
            # default double-buffered pipeline (correctness unaffected).
            pass
    return build(False)(*args)


def reference_forward(x, wqkv, bqkv, wproj, bproj, zeta_node, zeta_head, zeta_layer,
                      *, num_heads, head_size, scale=None,
                      prune_node=False, prune_head=False, prune_layer=False):
    """Pure-JAX mirror of SparseAttention.forward (PyTorch semantics)."""
    B, S, D = x.shape
    if scale is None:
        scale = head_size ** -0.5
    qkv = x @ wqkv.T + bqkv                                      # (B,S,3*H*Dh)
    qkv = qkv.reshape(B, S, 3, num_heads, head_size).transpose(2, 0, 3, 1, 4)
    if prune_node:
        qkv = qkv * jax.nn.sigmoid(
            jnp.reshape(zeta_node, (1, 1, num_heads, 1, head_size)))
    q, k, v = qkv[0], qkv[1], qkv[2]                             # (B,H,S,Dh)
    attn = jnp.einsum('bhqd,bhkd->bhqk', q, k) * scale
    attn = jax.nn.softmax(attn, axis=-1)
    out = jnp.einsum('bhqk,bhkd->bhqd', attn, v).transpose(0, 2, 1, 3)
    if prune_head:
        out = out * jax.nn.sigmoid(jnp.reshape(zeta_head, (1, 1, num_heads, 1)))
    out = out.reshape(B, S, num_heads * head_size)
    y = out @ wproj.T + bproj
    if prune_layer:
        y = y * jax.nn.sigmoid(jnp.reshape(zeta_layer, ()))
    return y


if __name__ == "__main__":
    # Small synthetic configuration (head_size is a multiple of 8, like ViT).
    B, S, D = 2, 16, 32
    H, Dh = 4, 8                      # num_heads, head_size
    hd = H * Dh
    prune_node, prune_head, prune_layer = False, True, True

    key = jax.random.PRNGKey(0)
    k_x, k_wqkv, k_bqkv, k_wproj, k_bproj = jax.random.split(key, 5)

    x = jax.random.normal(k_x, (B, S, D), dtype=jnp.float32)
    # PyTorch Linear layout: weight is (out_features, in_features).
    wqkv = jax.random.normal(k_wqkv, (3 * hd, D), dtype=jnp.float32) * 0.05
    bqkv = jax.random.normal(k_bqkv, (3 * hd,), dtype=jnp.float32) * 0.05
    wproj = jax.random.normal(k_wproj, (D, hd), dtype=jnp.float32) * 0.05
    bproj = jax.random.normal(k_bproj, (D,), dtype=jnp.float32) * 0.05
    # zeta masks init to ones, like torch.nn.Parameter(torch.ones(...)).
    zeta_node = jnp.ones((1, 1, H, 1, Dh), dtype=jnp.float32)
    zeta_head = jnp.ones((1, 1, H, 1), dtype=jnp.float32)
    zeta_layer = jnp.ones((1,), dtype=jnp.float32)

    ref = reference_forward(
        x, wqkv, bqkv, wproj, bproj, zeta_node, zeta_head, zeta_layer,
        num_heads=H, head_size=Dh,
        prune_node=prune_node, prune_head=prune_head, prune_layer=prune_layer,
    )

    # --- production path: bf16-stored weights / bf16 MXU operands ------------
    params_bf16 = prepare_params(
        wqkv, bqkv, wproj, bproj, zeta_node, zeta_head, zeta_layer,
        num_heads=H, head_size=Dh,
        prune_node=prune_node, prune_head=prune_head, prune_layer=prune_layer,
        compute_dtype=jnp.bfloat16)
    out_bf16 = jax.block_until_ready(sparse_attention(
        x, params_bf16, num_heads=H, head_size=Dh,
        prune_node=prune_node, prune_head=prune_head, prune_layer=prune_layer))
    np.testing.assert_allclose(np.asarray(out_bf16), np.asarray(ref),
                               rtol=3e-2, atol=3e-2)   # looser: bf16 operands

    # --- f32 path: tight correctness check ------------------------------------
    params_f32 = prepare_params(
        wqkv, bqkv, wproj, bproj, zeta_node, zeta_head, zeta_layer,
        num_heads=H, head_size=Dh,
        prune_node=prune_node, prune_head=prune_head, prune_layer=prune_layer,
        compute_dtype=jnp.float32)
    out_f32 = jax.block_until_ready(sparse_attention(
        x, params_f32, num_heads=H, head_size=Dh,
        prune_node=prune_node, prune_head=prune_head, prune_layer=prune_layer))
    np.testing.assert_allclose(np.asarray(out_f32), np.asarray(ref),
                               rtol=2e-4, atol=2e-5)

    print("KERNEL_OK")
</pallas_src>

<mosaic_0001>
module attributes {stable_mosaic.version = 11 : i64} {
  func.func @_sparse_attention_kernel(%arg0: i32, %arg1: memref<1x16x32xf32, #tpu.memory_space<vmem>>, %arg2: memref<32x96xbf16, #tpu.memory_space<vmem>>, %arg3: memref<1x96xf32, #tpu.memory_space<vmem>>, %arg4: memref<32x32xbf16, #tpu.memory_space<vmem>>, %arg5: memref<1x32xf32, #tpu.memory_space<vmem>>, %arg6: memref<4x8xf32, #tpu.memory_space<vmem>>, %arg7: memref<4x8xf32, #tpu.memory_space<vmem>>, %arg8: memref<1x1xf32, #tpu.memory_space<vmem>>, %arg9: memref<1x16x32xf32, #tpu.memory_space<vmem>>) attributes {dimension_semantics = [#tpu.dimension_semantics<parallel>], iteration_bounds = array<i64: 2>, scalar_prefetch = 0 : i64, scratch_operands = 0 : i64, tpu.core_type = #tpu.core_type<tc>, window_params = [{transform_indices = @transform_0, window_bounds = array<i64: 1, 16, 32>}, {pipeline_mode = #tpu.pipeline_mode<synchronous>, transform_indices = @transform_1, window_bounds = array<i64: 32, 96>}, {pipeline_mode = #tpu.pipeline_mode<synchronous>, transform_indices = @transform_2, window_bounds = array<i64: 1, 96>}, {pipeline_mode = #tpu.pipeline_mode<synchronous>, transform_indices = @transform_3, window_bounds = array<i64: 32, 32>}, {pipeline_mode = #tpu.pipeline_mode<synchronous>, transform_indices = @transform_4, window_bounds = array<i64: 1, 32>}, {pipeline_mode = #tpu.pipeline_mode<synchronous>, transform_indices = @transform_5, window_bounds = array<i64: 4, 8>}, {pipeline_mode = #tpu.pipeline_mode<synchronous>, transform_indices = @transform_6, window_bounds = array<i64: 4, 8>}, {pipeline_mode = #tpu.pipeline_mode<synchronous>, transform_indices = @transform_7, window_bounds = array<i64: 1, 1>}, {transform_indices = @transform_8, window_bounds = array<i64: 1, 16, 32>}]} {
    %c0 = arith.constant 0 : index
    %c0_0 = arith.constant 0 : index
    %c0_1 = arith.constant 0 : index
    %0 = vector.load %arg1[%c0, %c0_0, %c0_1] : memref<1x16x32xf32, #tpu.memory_space<vmem>>, vector<1x16x32xf32>
    %1 = vector.shape_cast %0 : vector<1x16x32xf32> to vector<16x32xf32>
    %2 = arith.truncf %1 : vector<16x32xf32> to vector<16x32xbf16>
    %c0_2 = arith.constant 0 : index
    %c0_3 = arith.constant 0 : index
    %3 = vector.load %arg2[%c0_2, %c0_3] : memref<32x96xbf16, #tpu.memory_space<vmem>>, vector<32x96xbf16>
    %cst = arith.constant dense<0.000000e+00> : vector<16x96xf32>
    %4 = tpu.matmul %2, %3, %cst {dimension_numbers = #tpu.dot_dimension_numbers<[1], [0], [0], [1], [0, 0, 1, 1], [], []>} : vector<16x32xbf16>, vector<32x96xbf16>, vector<16x96xf32> -> vector<16x96xf32>
    %c0_4 = arith.constant 0 : index
    %c0_5 = arith.constant 0 : index
    %5 = vector.load %arg3[%c0_4, %c0_5] : memref<1x96xf32, #tpu.memory_space<vmem>>, vector<1x96xf32>
    %6 = vector.shape_cast %5 : vector<1x96xf32> to vector<96xf32>
    %7 = vector.shape_cast %6 : vector<96xf32> to vector<1x96xf32>
    %8 = vector.broadcast %7 : vector<1x96xf32> to vector<16x96xf32>
    %9 = arith.addf %4, %8 : vector<16x96xf32>
    %10 = vector.shape_cast %9 : vector<16x96xf32> to vector<16x12x8xf32>
    %11 = tpu.transpose %10, [1, 0, 2] : vector<16x12x8xf32> -> vector<12x16x8xf32>
    %12 = vector.extract_strided_slice %11 {offsets = [0, 0, 0], sizes = [4, 16, 8], strides = [1, 1, 1]} : vector<12x16x8xf32> to vector<4x16x8xf32>
    %13 = vector.extract_strided_slice %11 {offsets = [4, 0, 0], sizes = [4, 16, 8], strides = [1, 1, 1]} : vector<12x16x8xf32> to vector<4x16x8xf32>
    %14 = vector.extract_strided_slice %11 {offsets = [8, 0, 0], sizes = [4, 16, 8], strides = [1, 1, 1]} : vector<12x16x8xf32> to vector<4x16x8xf32>
    %c0_6 = arith.constant 0 : index
    %c0_7 = arith.constant 0 : index
    %15 = vector.load %arg7[%c0_6, %c0_7] : memref<4x8xf32, #tpu.memory_space<vmem>>, vector<4x8xf32>
    %16 = arith.negf %15 : vector<4x8xf32>
    %17 = math.exp %16 : vector<4x8xf32>
    %cst_8 = arith.constant 1.000000e+00 : f32
    %18 = vector.broadcast %cst_8 : f32 to vector<4x8xf32>
    %19 = arith.addf %18, %17 : vector<4x8xf32>
    %20 = arith.divf %18, %19 : vector<4x8xf32>
    %21 = vector.shape_cast %20 : vector<4x8xf32> to vector<4x1x8xf32>
    %22 = vector.broadcast %21 : vector<4x1x8xf32> to vector<4x16x8xf32>
    %23 = arith.mulf %14, %22 : vector<4x16x8xf32>
    %24 = arith.truncf %12 : vector<4x16x8xf32> to vector<4x16x8xbf16>
    %25 = arith.truncf %13 : vector<4x16x8xf32> to vector<4x16x8xbf16>
    "tpu.trace_start"() <{level = 10 : i32, message = "hqd,hkd->hqk"}> : () -> ()
    %cst_9 = arith.constant dense<0.000000e+00> : vector<4x16x16xf32>
    %26 = tpu.matmul %24, %25, %cst_9 {dimension_numbers = #tpu.dot_dimension_numbers<[2], [2], [1], [1], [0, 0, 0, 1, 1, 1], [0], [0]>} : vector<4x16x8xbf16>, vector<4x16x8xbf16>, vector<4x16x16xf32> -> vector<4x16x16xf32>
    "tpu.trace_stop"() : () -> ()
    %cst_10 = arith.constant dense<0xFF800000> : vector<4x16xf32>
    %27 = vector.multi_reduction <maximumf>, %26, %cst_10 [2] : vector<4x16x16xf32> to vector<4x16xf32>
    %28 = vector.shape_cast %27 : vector<4x16xf32> to vector<4x16x1xf32>
    %29 = vector.broadcast %28 : vector<4x16x1xf32> to vector<4x16x16xf32>
    %30 = arith.subf %26, %29 : vector<4x16x16xf32>
    %31 = math.exp %30 : vector<4x16x16xf32>
    %cst_11 = arith.constant dense<0.000000e+00> : vector<4x16xf32>
    %32 = vector.multi_reduction <add>, %31, %cst_11 [2] : vector<4x16x16xf32> to vector<4x16xf32>
    %33 = vector.shape_cast %32 : vector<4x16xf32> to vector<4x16x1xf32>
    %34 = arith.truncf %31 : vector<4x16x16xf32> to vector<4x16x16xbf16>
    %35 = arith.truncf %23 : vector<4x16x8xf32> to vector<4x16x8xbf16>
    "tpu.trace_start"() <{level = 10 : i32, message = "hqk,hkd->hqd"}> : () -> ()
    %cst_12 = arith.constant dense<0.000000e+00> : vector<4x16x8xf32>
    %36 = tpu.matmul %34, %35, %cst_12 {dimension_numbers = #tpu.dot_dimension_numbers<[2], [1], [1], [2], [0, 0, 0, 1, 1, 2], [0], [0]>} : vector<4x16x16xbf16>, vector<4x16x8xbf16>, vector<4x16x8xf32> -> vector<4x16x8xf32>
    "tpu.trace_stop"() : () -> ()
    %37 = tpu.reciprocal %33 {approx = true} : vector<4x16x1xf32> -> vector<4x16x1xf32>
    %38 = vector.broadcast %37 : vector<4x16x1xf32> to vector<4x16x8xf32>
    %39 = arith.mulf %36, %38 : vector<4x16x8xf32>
    %40 = tpu.transpose %39, [1, 0, 2] : vector<4x16x8xf32> -> vector<16x4x8xf32>
    %41 = vector.shape_cast %40 : vector<16x4x8xf32> to vector<16x32xf32>
    %42 = arith.truncf %41 : vector<16x32xf32> to vector<16x32xbf16>
    %c0_13 = arith.constant 0 : index
    %c0_14 = arith.constant 0 : index
    %43 = vector.load %arg4[%c0_13, %c0_14] : memref<32x32xbf16, #tpu.memory_space<vmem>>, vector<32x32xbf16>
    %cst_15 = arith.constant dense<0.000000e+00> : vector<16x32xf32>
    %44 = tpu.matmul %42, %43, %cst_15 {dimension_numbers = #tpu.dot_dimension_numbers<[1], [0], [0], [1], [0, 0, 1, 1], [], []>} : vector<16x32xbf16>, vector<32x32xbf16>, vector<16x32xf32> -> vector<16x32xf32>
    %c0_16 = arith.constant 0 : index
    %c0_17 = arith.constant 0 : index
    %45 = vector.load %arg5[%c0_16, %c0_17] : memref<1x32xf32, #tpu.memory_space<vmem>>, vector<1x32xf32>
    %46 = vector.shape_cast %45 : vector<1x32xf32> to vector<32xf32>
    %47 = vector.shape_cast %46 : vector<32xf32> to vector<1x32xf32>
    %48 = vector.broadcast %47 : vector<1x32xf32> to vector<16x32xf32>
    %49 = arith.addf %44, %48 : vector<16x32xf32>
    %c0_18 = arith.constant 0 : index
    %c0_19 = arith.constant 0 : index
    %50 = vector.load %arg8[%c0_18, %c0_19] : memref<1x1xf32, #tpu.memory_space<vmem>>, vector<1x1xf32>
    %51 = arith.negf %50 : vector<1x1xf32>
    %52 = math.exp %51 : vector<1x1xf32>
    %cst_20 = arith.constant 1.000000e+00 : f32
    %53 = vector.broadcast %cst_20 : f32 to vector<1x1xf32>
    %54 = arith.addf %53, %52 : vector<1x1xf32>
    %55 = arith.divf %53, %54 : vector<1x1xf32>
    %56 = vector.broadcast %55 : vector<1x1xf32> to vector<16x32xf32>
    %57 = arith.mulf %49, %56 : vector<16x32xf32>
    %c0_21 = arith.constant 0 : index
    %c0_22 = arith.constant 0 : index
    %c0_23 = arith.constant 0 : index
    %58 = vector.load %arg9[%c0_21, %c0_22, %c0_23] : memref<1x16x32xf32, #tpu.memory_space<vmem>>, vector<1x16x32xf32>
    %59 = vector.shape_cast %58 : vector<1x16x32xf32> to vector<16x32xf32>
    %60 = vector.shape_cast %57 : vector<16x32xf32> to vector<1x16x32xf32>
    tpu.vector_store %arg9[%c0_21, %c0_22, %c0_23], %60 {strides = array<i32>} : memref<1x16x32xf32, #tpu.memory_space<vmem>>, vector<1x16x32xf32>,
    return
  }
  func.func @transform_0(%arg0: i32) -> (i32, i32, i32) {
    %c0_i32 = arith.constant 0 : i32
    %c0_i32_0 = arith.constant 0 : i32
    %c0_i32_1 = arith.constant 0 : i32
    return %arg0, %c0_i32, %c0_i32_0 : i32, i32, i32
  }
  func.func @transform_1(%arg0: i32) -> (i32, i32) {
    %c0_i32 = arith.constant 0 : i32
    %c0_i32_0 = arith.constant 0 : i32
    %c0_i32_1 = arith.constant 0 : i32
    return %c0_i32, %c0_i32_0 : i32, i32
  }
  func.func @transform_2(%arg0: i32) -> (i32, i32) {
    %c0_i32 = arith.constant 0 : i32
    %c0_i32_0 = arith.constant 0 : i32
    %c0_i32_1 = arith.constant 0 : i32
    return %c0_i32, %c0_i32_0 : i32, i32
  }
  func.func @transform_3(%arg0: i32) -> (i32, i32) {
    %c0_i32 = arith.constant 0 : i32
    %c0_i32_0 = arith.constant 0 : i32
    %c0_i32_1 = arith.constant 0 : i32
    return %c0_i32, %c0_i32_0 : i32, i32
  }
  func.func @transform_4(%arg0: i32) -> (i32, i32) {
    %c0_i32 = arith.constant 0 : i32
    %c0_i32_0 = arith.constant 0 : i32
    %c0_i32_1 = arith.constant 0 : i32
    return %c0_i32, %c0_i32_0 : i32, i32
  }
  func.func @transform_5(%arg0: i32) -> (i32, i32) {
    %c0_i32 = arith.constant 0 : i32
    %c0_i32_0 = arith.constant 0 : i32
    %c0_i32_1 = arith.constant 0 : i32
    return %c0_i32, %c0_i32_0 : i32, i32
  }
  func.func @transform_6(%arg0: i32) -> (i32, i32) {
    %c0_i32 = arith.constant 0 : i32
    %c0_i32_0 = arith.constant 0 : i32
    %c0_i32_1 = arith.constant 0 : i32
    return %c0_i32, %c0_i32_0 : i32, i32
  }
  func.func @transform_7(%arg0: i32) -> (i32, i32) {
    %c0_i32 = arith.constant 0 : i32
    %c0_i32_0 = arith.constant 0 : i32
    %c0_i32_1 = arith.constant 0 : i32
    return %c0_i32, %c0_i32_0 : i32, i32
  }
  func.func @transform_8(%arg0: i32) -> (i32, i32, i32) {
    %c0_i32 = arith.constant 0 : i32
    %c0_i32_0 = arith.constant 0 : i32
    %c0_i32_1 = arith.constant 0 : i32
    return %arg0, %c0_i32, %c0_i32_0 : i32, i32, i32
  }
}

module attributes {stable_mosaic.version = 11 : i64} {
  func.func @_sparse_attention_kernel(%arg0: i32, %arg1: memref<1x16x32xf32, #tpu.memory_space<vmem>>, %arg2: memref<32x96xbf16, #tpu.memory_space<vmem>>, %arg3: memref<1x96xf32, #tpu.memory_space<vmem>>, %arg4: memref<32x32xbf16, #tpu.memory_space<vmem>>, %arg5: memref<1x32xf32, #tpu.memory_space<vmem>>, %arg6: memref<4x8xf32, #tpu.memory_space<vmem>>, %arg7: memref<4x8xf32, #tpu.memory_space<vmem>>, %arg8: memref<1x1xf32, #tpu.memory_space<vmem>>, %arg9: memref<1x16x32xf32, #tpu.memory_space<vmem>>) attributes {dimension_semantics = [#tpu.dimension_semantics<parallel>], iteration_bounds = array<i64: 2>, scalar_prefetch = 0 : i64, scratch_operands = 0 : i64, tpu.core_type = #tpu.core_type<tc>, window_params = [{transform_indices = @transform_0, window_bounds = array<i64: 1, 16, 32>}, {pipeline_mode = #tpu.pipeline_mode<synchronous>, transform_indices = @transform_1, window_bounds = array<i64: 32, 96>}, {pipeline_mode = #tpu.pipeline_mode<synchronous>, transform_indices = @transform_2, window_bounds = array<i64: 1, 96>}, {pipeline_mode = #tpu.pipeline_mode<synchronous>, transform_indices = @transform_3, window_bounds = array<i64: 32, 32>}, {pipeline_mode = #tpu.pipeline_mode<synchronous>, transform_indices = @transform_4, window_bounds = array<i64: 1, 32>}, {pipeline_mode = #tpu.pipeline_mode<synchronous>, transform_indices = @transform_5, window_bounds = array<i64: 4, 8>}, {pipeline_mode = #tpu.pipeline_mode<synchronous>, transform_indices = @transform_6, window_bounds = array<i64: 4, 8>}, {pipeline_mode = #tpu.pipeline_mode<synchronous>, transform_indices = @transform_7, window_bounds = array<i64: 1, 1>}, {transform_indices = @transform_8, window_bounds = array<i64: 1, 16, 32>}]} {
    %c0 = arith.constant 0 : index
    %c0_0 = arith.constant 0 : index
    %c0_1 = arith.constant 0 : index
    %0 = vector.load %arg1[%c0, %c0_0, %c0_1] : memref<1x16x32xf32, #tpu.memory_space<vmem>>, vector<1x16x32xf32>
    %1 = vector.shape_cast %0 : vector<1x16x32xf32> to vector<16x32xf32>
    %2 = arith.truncf %1 : vector<16x32xf32> to vector<16x32xbf16>
    %c0_2 = arith.constant 0 : index
    %c0_3 = arith.constant 0 : index
    %3 = vector.load %arg2[%c0_2, %c0_3] : memref<32x96xbf16, #tpu.memory_space<vmem>>, vector<32x96xbf16>
    %cst = arith.constant dense<0.000000e+00> : vector<16x96xf32>
    %4 = tpu.matmul %2, %3, %cst {dimension_numbers = #tpu.dot_dimension_numbers<[1], [0], [0], [1], [0, 0, 1, 1], [], []>} : vector<16x32xbf16>, vector<32x96xbf16>, vector<16x96xf32> -> vector<16x96xf32>
    %c0_4 = arith.constant 0 : index
    %c0_5 = arith.constant 0 : index
    %5 = vector.load %arg3[%c0_4, %c0_5] : memref<1x96xf32, #tpu.memory_space<vmem>>, vector<1x96xf32>
    %6 = vector.shape_cast %5 : vector<1x96xf32> to vector<96xf32>
    %7 = vector.shape_cast %6 : vector<96xf32> to vector<1x96xf32>
    %8 = vector.broadcast %7 : vector<1x96xf32> to vector<16x96xf32>
    %9 = arith.addf %4, %8 : vector<16x96xf32>
    %10 = vector.shape_cast %9 : vector<16x96xf32> to vector<16x12x8xf32>
    %11 = tpu.transpose %10, [1, 0, 2] : vector<16x12x8xf32> -> vector<12x16x8xf32>
    %12 = vector.extract_strided_slice %11 {offsets = [0, 0, 0], sizes = [4, 16, 8], strides = [1, 1, 1]} : vector<12x16x8xf32> to vector<4x16x8xf32>
    %13 = vector.extract_strided_slice %11 {offsets = [4, 0, 0], sizes = [4, 16, 8], strides = [1, 1, 1]} : vector<12x16x8xf32> to vector<4x16x8xf32>
    %14 = vector.extract_strided_slice %11 {offsets = [8, 0, 0], sizes = [4, 16, 8], strides = [1, 1, 1]} : vector<12x16x8xf32> to vector<4x16x8xf32>
    %c0_6 = arith.constant 0 : index
    %c0_7 = arith.constant 0 : index
    %15 = vector.load %arg7[%c0_6, %c0_7] : memref<4x8xf32, #tpu.memory_space<vmem>>, vector<4x8xf32>
    %16 = arith.negf %15 : vector<4x8xf32>
    %17 = math.exp %16 : vector<4x8xf32>
    %cst_8 = arith.constant 1.000000e+00 : f32
    %18 = vector.broadcast %cst_8 : f32 to vector<4x8xf32>
    %19 = arith.addf %18, %17 : vector<4x8xf32>
    %20 = arith.divf %18, %19 : vector<4x8xf32>
    %21 = vector.shape_cast %20 : vector<4x8xf32> to vector<4x1x8xf32>
    %22 = vector.broadcast %21 : vector<4x1x8xf32> to vector<4x16x8xf32>
    %23 = arith.mulf %14, %22 : vector<4x16x8xf32>
    %24 = arith.truncf %12 : vector<4x16x8xf32> to vector<4x16x8xbf16>
    %25 = arith.truncf %13 : vector<4x16x8xf32> to vector<4x16x8xbf16>
    "tpu.trace_start"() <{level = 10 : i32, message = "hqd,hkd->hqk"}> : () -> ()
    %cst_9 = arith.constant dense<0.000000e+00> : vector<4x16x16xf32>
    %26 = tpu.matmul %24, %25, %cst_9 {dimension_numbers = #tpu.dot_dimension_numbers<[2], [2], [1], [1], [0, 0, 0, 1, 1, 1], [0], [0]>} : vector<4x16x8xbf16>, vector<4x16x8xbf16>, vector<4x16x16xf32> -> vector<4x16x16xf32>
    "tpu.trace_stop"() : () -> ()
    %cst_10 = arith.constant dense<0xFF800000> : vector<4x16xf32>
    %27 = vector.multi_reduction <maximumf>, %26, %cst_10 [2] : vector<4x16x16xf32> to vector<4x16xf32>
    %28 = vector.shape_cast %27 : vector<4x16xf32> to vector<4x16x1xf32>
    %29 = vector.broadcast %28 : vector<4x16x1xf32> to vector<4x16x16xf32>
    %30 = arith.subf %26, %29 : vector<4x16x16xf32>
    %31 = math.exp %30 : vector<4x16x16xf32>
    %cst_11 = arith.constant dense<0.000000e+00> : vector<4x16xf32>
    %32 = vector.multi_reduction <add>, %31, %cst_11 [2] : vector<4x16x16xf32> to vector<4x16xf32>
    %33 = vector.shape_cast %32 : vector<4x16xf32> to vector<4x16x1xf32>
    %34 = arith.truncf %31 : vector<4x16x16xf32> to vector<4x16x16xbf16>
    %35 = arith.truncf %23 : vector<4x16x8xf32> to vector<4x16x8xbf16>
    "tpu.trace_start"() <{level = 10 : i32, message = "hqk,hkd->hqd"}> : () -> ()
    %cst_12 = arith.constant dense<0.000000e+00> : vector<4x16x8xf32>
    %36 = tpu.matmul %34, %35, %cst_12 {dimension_numbers = #tpu.dot_dimension_numbers<[2], [1], [1], [2], [0, 0, 0, 1, 1, 2], [0], [0]>} : vector<4x16x16xbf16>, vector<4x16x8xbf16>, vector<4x16x8xf32> -> vector<4x16x8xf32>
    "tpu.trace_stop"() : () -> ()
    %37 = tpu.reciprocal %33 {approx = true} : vector<4x16x1xf32> -> vector<4x16x1xf32>
    %38 = vector.broadcast %37 : vector<4x16x1xf32> to vector<4x16x8xf32>
    %39 = arith.mulf %36, %38 : vector<4x16x8xf32>
    %40 = tpu.transpose %39, [1, 0, 2] : vector<4x16x8xf32> -> vector<16x4x8xf32>
    %41 = vector.shape_cast %40 : vector<16x4x8xf32> to vector<16x32xf32>
    %42 = arith.truncf %41 : vector<16x32xf32> to vector<16x32xbf16>
    %c0_13 = arith.constant 0 : index
    %c0_14 = arith.constant 0 : index
    %43 = vector.load %arg4[%c0_13, %c0_14] : memref<32x32xbf16, #tpu.memory_space<vmem>>, vector<32x32xbf16>
    %cst_15 = arith.constant dense<0.000000e+00> : vector<16x32xf32>
    %44 = tpu.matmul %42, %43, %cst_15 {dimension_numbers = #tpu.dot_dimension_numbers<[1], [0], [0], [1], [0, 0, 1, 1], [], []>} : vector<16x32xbf16>, vector<32x32xbf16>, vector<16x32xf32> -> vector<16x32xf32>
    %c0_16 = arith.constant 0 : index
    %c0_17 = arith.constant 0 : index
    %45 = vector.load %arg5[%c0_16, %c0_17] : memref<1x32xf32, #tpu.memory_space<vmem>>, vector<1x32xf32>
    %46 = vector.shape_cast %45 : vector<1x32xf32> to vector<32xf32>
    %47 = vector.shape_cast %46 : vector<32xf32> to vector<1x32xf32>
    %48 = vector.broadcast %47 : vector<1x32xf32> to vector<16x32xf32>
    %49 = arith.addf %44, %48 : vector<16x32xf32>
    %c0_18 = arith.constant 0 : index
    %c0_19 = arith.constant 0 : index
    %50 = vector.load %arg8[%c0_18, %c0_19] : memref<1x1xf32, #tpu.memory_space<vmem>>, vector<1x1xf32>
    %51 = arith.negf %50 : vector<1x1xf32>
    %52 = math.exp %51 : vector<1x1xf32>
    %cst_20 = arith.constant 1.000000e+00 : f32
    %53 = vector.broadcast %cst_20 : f32 to vector<1x1xf32>
    %54 = arith.addf %53, %52 : vector<1x1xf32>
    %55 = arith.divf %53, %54 : vector<1x1xf32>
    %56 = vector.broadcast %55 : vector<1x1xf32> to vector<16x32xf32>
    %57 = arith.mulf %49, %56 : vector<16x32xf32>
    %c0_21 = arith.constant 0 : index
    %c0_22 = arith.constant 0 : index
    %c0_23 = arith.constant 0 : index
    %58 = vector.load %arg9[%c0_21, %c0_22, %c0_23] : memref<1x16x32xf32, #tpu.memory_space<vmem>>, vector<1x16x32xf32>
    %59 = vector.shape_cast %58 : vector<1x16x32xf32> to vector<16x32xf32>
    %60 = vector.shape_cast %57 : vector<16x32xf32> to vector<1x16x32xf32>
    tpu.vector_store %arg9[%c0_21, %c0_22, %c0_23], %60 {strides = array<i32>} : memref<1x16x32xf32, #tpu.memory_space<vmem>>, vector<1x16x32xf32>,
    return
  }
  func.func @transform_0(%arg0: i32) -> (i32, i32, i32) {
    %c0_i32 = arith.constant 0 : i32
    %c0_i32_0 = arith.constant 0 : i32
    %c0_i32_1 = arith.constant 0 : i32
    return %arg0, %c0_i32, %c0_i32_0 : i32, i32, i32
  }
  func.func @transform_1(%arg0: i32) -> (i32, i32) {
    %c0_i32 = arith.constant 0 : i32
    %c0_i32_0 = arith.constant 0 : i32
    %c0_i32_1 = arith.constant 0 : i32
    return %c0_i32, %c0_i32_0 : i32, i32
  }
  func.func @transform_2(%arg0: i32) -> (i32, i32) {
    %c0_i32 = arith.constant 0 : i32
    %c0_i32_0 = arith.constant 0 : i32
    %c0_i32_1 = arith.constant 0 : i32
    return %c0_i32, %c0_i32_0 : i32, i32
  }
  func.func @transform_3(%arg0: i32) -> (i32, i32) {
    %c0_i32 = arith.constant 0 : i32
    %c0_i32_0 = arith.constant 0 : i32
    %c0_i32_1 = arith.constant 0 : i32
    return %c0_i32, %c0_i32_0 : i32, i32
  }
  func.func @transform_4(%arg0: i32) -> (i32, i32) {
    %c0_i32 = arith.constant 0 : i32
    %c0_i32_0 = arith.constant 0 : i32
    %c0_i32_1 = arith.constant 0 : i32
    return %c0_i32, %c0_i32_0 : i32, i32
  }
  func.func @transform_5(%arg0: i32) -> (i32, i32) {
    %c0_i32 = arith.constant 0 : i32
    %c0_i32_0 = arith.constant 0 : i32
    %c0_i32_1 = arith.constant 0 : i32
    return %c0_i32, %c0_i32_0 : i32, i32
  }
  func.func @transform_6(%arg0: i32) -> (i32, i32) {
    %c0_i32 = arith.constant 0 : i32
    %c0_i32_0 = arith.constant 0 : i32
    %c0_i32_1 = arith.constant 0 : i32
    return %c0_i32, %c0_i32_0 : i32, i32
  }
  func.func @transform_7(%arg0: i32) -> (i32, i32) {
    %c0_i32 = arith.constant 0 : i32
    %c0_i32_0 = arith.constant 0 : i32
    %c0_i32_1 = arith.constant 0 : i32
    return %c0_i32, %c0_i32_0 : i32, i32
  }
  func.func @transform_8(%arg0: i32) -> (i32, i32, i32) {
    %c0_i32 = arith.constant 0 : i32
    %c0_i32_0 = arith.constant 0 : i32
    %c0_i32_1 = arith.constant 0 : i32
    return %arg0, %c0_i32, %c0_i32_0 : i32, i32, i32
  }
}

</mosaic_0001>

<bundles_post_ra>
// kernel: tpu_custom_call.1
= control target key start
LH: loop header
LB: loop body
LE: loop exit
PB: predicated region body
PF: predicated region fallthrough
CT: control target
= control target key end

     0   :  { %s3459_s0 = inlined_call_operand.hbm [shape: f32[2,16,32], index: 0, kind: input, shape index: {}]   ;;  %s3460_s1 = inlined_call_operand.hbm [shape: bf16[32,96], index: 1, kind: input, shape index: {}]   ;;  %s3461_s2 = inlined_call_operand.vmem [shape: f32[1,96], index: 2, kind: input, shape index: {}]   ;;  %s3462_s3 = inlined_call_operand.hbm [shape: bf16[32,32], index: 3, kind: input, shape index: {}]   ;;  %s3463_s4 = inlined_call_operand.hbm [shape: f32[1,32], index: 4, kind: input, shape index: {}]   ;;  %s3464_s5 = inlined_call_operand.vmem [shape: f32[4,8], index: 5, kind: input, shape index: {}]   ;;  %s3465_s6 = inlined_call_operand.vmem [shape: f32[4,8], index: 6, kind: input, shape index: {}]   ;;  %s3466_s7 = inlined_call_operand.<no memory space> [shape: f32[1,1], index: 7, kind: input, shape index: {}]   ;;  %s3467_s8 = inlined_call_operand.hbm [shape: f32[2,16,32], index: 8, kind: output, shape index: {}]  }
   0x1   :  { %v13_v0 = vstv %s3466_s7 }
   0x2   :  { %14 = vst [vmem:[#allocation2] sm:$0x1] %v13_v0 }
   0x3   :  { %15 = vsyncpa [#allocation4], 0 }
   0x4   :  { %17 = vsyncpa [#allocation4 + $0x1], 0 }
   0x5   :  { %18 = vsyncpa [#allocation7], 0 }
   0x6   :  { %19 = vsyncpa [#allocation10], 0 }
   0x7   :  { %20 = vsyncpa [#allocation5], 0 }
   0x8   :  { %22 = vsyncpa [#allocation5 + $0x1], 0  ;;  %s2932_s5 = smov 0   ;;  %s2934_s29 = smov 0  }
   0x9   :  { %s2936_s30 = smov 0   ;;  %s2938_s9 = smov 0  }
   0xa LB: > { %s2953_s7 = sadd.s32 4294967295, %s2852_s9   ;;  %s2361_s10 = sadd.s32 4294967294, %s2852_s9   ;;  %s2852_s9 = sphi %s2938_s9, %s3491_s9   ;;  %s2848_s30 = sphi %s2936_s30, %s3490_s30   ;;  %s2844_s29 = sphi %s2934_s29, %s3489_s29   ;;  %s2840_s5 = sphi %s2932_s5, %s3488_s5  }
   0xb   : > { %p48_p0 = scmp.ne.s32.totalorder %s2844_s29, %s2840_s5  ;;  %p3468_p1 = scmp.eq.s32.totalorder %s2953_s7, 0 }
   0xc   : > { %p225_p3 = scmp.eq.s32.totalorder %s2361_s10, 1  ;;  %p2362_p5 = scmp.ge.s32.totalorder %s2852_s9, 1 }
   0xd   : > { %p2962_p4 = por %p3468_p1, %p48_p0  ;;  %p232_p7 = scmp.lt.s32.totalorder %s2852_s9, 3 }
   0xe   : > { %p2967_p6 = por %p225_p3, %p48_p0  ;;  %s2854_s14 = smov [#allocation6]  }
   0xf   : > { %s3472_s11 = scalar_select %p2962_p4, 1, 0 }
  0x10   : > { %s3473_s12 = scalar_select %p2967_p6, 1, 0 }
  0x11   : > { %p2972_p8 = pnand %p2362_p5, %p232_p7  ;;  %s244_s15 = sshll.u32 %s2854_s14, 4  ;;  %s245_s15 = int_to_ptr.vmem [resolvable:$true] %s244_s15 }
  0x12   : > { %s2855_s17 = smov [#allocation8]   ;;  %s2856_s19 = smov [#allocation9]  }
  0x13   : > { %s3474_s13 = scalar_select %p2972_p8, 1, 0 }
  0x14   : > { %p2527_p9 = pneg %p2972_p8  ;;  %s260_s18 = sshll.u32 %s2855_s17, 4  ;;  %s261_s18 = int_to_ptr.vmem [resolvable:$true] %s260_s18 }
  0x15   : > { %s274_s20 = sshll.u32 %s2856_s19, 4  ;;  %s2685_s21 = scalar_lea.vmem %s245_s15, 256  ;;  %s275_s20 = int_to_ptr.vmem [resolvable:$true] %s274_s20 }
  0x16   : > { %p2981_p11 = pnand %p2527_p9, %p3468_p1  ;;  %p2686_p13 = scmp.ne.s32.totalorder %s245_s15, %s2685_s21 }
  0x17   : > { %p2693_p5 = scmp.lt.s32.totalorder %s245_s15, %s245_s15  ;;  %p2694_p7 = scmp.lt.s32.totalorder %s2685_s21, %s2685_s21 }
  0x18   : > { %p2676_p12 = pneg %p2981_p11 }
  0x19   : > { %p2695_p9 = por %p2694_p7, %p2693_p5 }
  0x1a   : > { %p2688_p0 = pnand %p2686_p13, %p2676_p12 }
  0x1c   : > { %p2689_p3 = pneg %p2688_p0 }
  0x1e   : > { %p2696_p10 = pnand %p2695_p9, %p2689_p3 }
  0x20   : > { %2699 = shalt.err (!%p2696_p10)
}
  0x21   : > { %s2857_s22 = smov 64   ;;  %s2858_s23 = smov 4  }
  0x22   : > { %2530 = dma.hbm_to_vmem [thread:$0]  (!%p2981_p11), %s3460_s1, 256, %s245_s15, [#allocation7], %s2857_s22, %s2857_s22, %s2858_s23  }
  0x23   : > { %s2711_s26 = scalar_lea.vmem %s261_s18, 256  ;;  %p2719_p2 = scmp.lt.s32.totalorder %s261_s18, %s261_s18 }
  0x24   : > { %p2712_p1 = scmp.ne.s32.totalorder %s261_s18, %s2711_s26  ;;  %p2720_p6 = scmp.lt.s32.totalorder %s2711_s26, %s2711_s26 }
  0x26   : > { %p2714_p13 = pnand %p2712_p1, %p2676_p12  ;;  %p2721_p5 = por %p2720_p6, %p2719_p2 }
  0x28   : > { %p2715_p0 = pneg %p2714_p13 }
  0x2a   : > { %p2722_p3 = pnand %p2721_p5, %p2715_p0 }
  0x2c   : > { %2725 = shalt.err (!%p2722_p3)
}
  0x2d   : > { %2533 = dma.hbm_to_vmem [thread:$0]  (!%p2981_p11), %s3462_s3, 256, %s261_s18, [#allocation7], %s2857_s22, %s2857_s22, %s2858_s23  }
  0x2e   : > { %s2737_s10 = scalar_lea.vmem %s275_s20, 16  ;;  %s2744_s14 = scalar_lea.vmem %s275_s20, 32 }
  0x2f   : > { %p2738_p10 = scmp.ne.s32.totalorder %s275_s20, %s2737_s10  ;;  %p2745_p9 = scmp.lt.s32.totalorder %s275_s20, %s275_s20 }
  0x30   : > { %p2746_p13 = scmp.lt.s32.totalorder %s2744_s14, %s2737_s10 }
  0x31   : > { %p2740_p7 = pnand %p2738_p10, %p2676_p12 }
  0x32   : > { %p2747_p2 = por %p2746_p13, %p2745_p9 }
  0x33   : > { %p2741_p1 = pneg %p2740_p7 }
  0x35   : > { %p2748_p6 = pnand %p2747_p2, %p2741_p1 }
  0x37   : > { %2751 = shalt.err (!%p2748_p6)
}
  0x38   : > { %2536 = dma.hbm_to_vmem [thread:$0]  (!%p2981_p11), %s3463_s4, 16, %s275_s20, [#allocation10]  }
  0x39   : > { %s3012_s18 = sadd.s32 1, %s2852_s9   ;;  %s35_s16 = sadd.s32 1, %s2848_s30 }
  0x3a   : > { %s32_s19 = ssub.s32 %s2852_s9, %s3012_s18  ;;  %p42_p0 = scmp.ne.s32.totalorder %s2848_s30, %s2844_s29 }
  0x3b   : > { %p33_p12 = scmp.eq.s32.totalorder %s32_s19, 0  ;;  %p43_p5 = scmp.eq.s32.totalorder %s2852_s9, 0 }
  0x3c   : > { %p2548_p3 = scmp.lt.s32.totalorder %s2852_s9, 2  ;;  %p3476_p7 = scmp.eq.s32.totalorder %s2953_s7, 1 }
  0x3d   : > { %s3022_s21 = scalar_select %p33_p12, %s2848_s30, %s35_s16  }
  0x3e   : > { %p44_p10 = por %p43_p5, %p42_p0  ;;  %p3026_p1 = por %p3476_p7, %p42_p0 }
  0x3f   : > { %s294_s23 = sand.u32 1, %s2848_s30   ;;  %s2423_s24 = sshll.u32 %s2852_s9, 8 }
  0x40   : > { %s3477_s22 = scalar_select %p3026_p1, 1, 0 }
  0x41   : > { %s2367_s20 = sshll.u32 %s294_s23, 4  ;;  %s3035_s27 = scalar_lea.hbm %s3459_s0, %s2423_s24 }
  0x42   : > { %s298_s28 = scalar_lea.vmem [#allocation3], %s2367_s20  ;;  %p3037_p11 = pnand %p2548_p3, %p44_p10 }
  0x43   : > { %s305_s10 = sshll.u32 %s298_s28, 4  ;;  %s3043_s15 = scalar_lea.sflag [#allocation4], %s294_s23  ;;  %s3041_s10 = int_to_ptr.vmem [resolvable:$true] %s305_s10 }
  0x44   : > { %s2752_s17 = scalar_lea.hbm %s3035_s27, 256  ;;  %p2754_p13 = pneg %p3037_p11 }
  0x45   : > { %p2753_p9 = scmp.ne.s32.totalorder %s3035_s27, %s2752_s17  ;;  %s2757_s24 = scalar_lea.hbm %s3459_s0, 512 }
  0x46   : > { %p2758_p12 = scmp.lt.s32.totalorder %s3035_s27, %s3459_s0  ;;  %p2759_p0 = scmp.lt.s32.totalorder %s2757_s24, %s2752_s17 }
  0x47   : > { %p2755_p2 = pnand %p2754_p13, %p2753_p9 }
  0x48   : > { %p2760_p5 = por %p2759_p0, %p2758_p12 }
  0x49   : > { %p2756_p6 = pneg %p2755_p2 }
  0x4b   : > { %p2761_p3 = pnand %p2760_p5, %p2756_p6 }
  0x4d   : > { %2764 = shalt.err (!%p2761_p3)
}
  0x4e   : > { %s2765_s23 = scalar_lea.vmem %s3041_s10, 256  ;;  %s2859_s26 = smov [#allocation3]  }
  0x4f   : > { %p2766_p10 = scmp.ne.s32.totalorder %s3041_s10, %s2765_s23  ;;  %s2770_s28 = sshll.u32 %s2859_s26, 4  ;;  %s2771_s28 = int_to_ptr.vmem [resolvable:$false] %s2770_s28 }
  0x50   : > { %s2772_s19 = scalar_lea.vmem %s2771_s28, 512  ;;  %p2773_p2 = scmp.lt.s32.totalorder %s3041_s10, %s2771_s28 }
  0x51   : > { %p2768_p7 = pnand %p2766_p10, %p2754_p13  ;;  %p2774_p1 = scmp.lt.s32.totalorder %s2772_s19, %s2765_s23 }
  0x53   : > { %p2769_p9 = pneg %p2768_p7  ;;  %p2775_p4 = por %p2774_p1, %p2773_p2 }
  0x55   : > { %p2776_p8 = pnand %p2775_p4, %p2769_p9 }
  0x57   : > { %2779 = shalt.err (!%p2776_p8)
}
  0x58   : > { %s2860_s17 = smov 128   ;;  %s2861_s16 = smov 8  }
  0x59   : > { %2540 = dma.hbm_to_vmem [thread:$0]  (!%p3037_p11), %s3035_s27, 256, %s3041_s10, %s3043_s15, %s2860_s17, %s2860_s17, %s2861_s16  }
  0x5a   : > { %p3479_p13 = scmp.ne.s32.totalorder %s3474_s13, 0 }
  0x5b   : > { %s3067_s24 = sand.u32 (!%p3479_p13), 1, %s2844_s29   ;;  %p3480_p4 = scmp.ne.s32.totalorder (!%p3479_p13), %s3472_s11, 0 }
  0x5c   : > { %317 = sbr.rel (%p3479_p13) target bundleno = 1444 (0x5a4), region = 52  ;;  %s2371_s20 = sshll.u32 (!%p3479_p13), %s3067_s24, 4 }
  0x5d   : > { %s320_s25 = scalar_lea.sflag (!%p3479_p13), [#allocation4], %s3067_s24  ;;  %s323_s23 = scalar_lea.vmem (!%p3479_p13), [#allocation3], %s2371_s20 }
  0x61   : > { %2823 = dma.done.wait (%p3480_p4), %s320_s25, 256  }
  0x62   : > { %2825 = vsyncadd (%p3480_p4), %s320_s25, 4294967040  ;;  %p3481_p8 = scmp.eq.s32.totalorder %s2953_s7, 0 }
  0x64   : > { %2827 = dma.done.wait (%p3481_p8), [#allocation7], 512   ;;  %p3482_p1 = pmov %p3481_p8 }
  0x66   : > { %2829 = vsyncadd (%p3482_p1), [#allocation7], 4294966784  ;;  %p3483_p11 = pmov %p3482_p1 }
  0x67   : > { %p3484_p6 = pmov %p3482_p1 }
  0x68   : > { %2831 = dma.done.wait (%p3483_p11), [#allocation10], 16  }
  0x69   : > { %2833 = vsyncadd (%p3484_p6), [#allocation10], 4294967280  ;;  %v2862_v1 = vmov 0.0   ;;  %vm2863_vm0 = vmmov 0   ;;  %v2630_v2 = vld [vmem:[#allocation6 + $0x8] sm:$0xff]   ;;  %v2631_v3 = vld [vmem:[#allocation6] sm:$0xff]   ;;  %v513_v20 = vlaneseq }
  0x6a   : > { %2447 = vmatprep.subr.bf16.mxu0 %v2862_v1  ;;  %2451 = vmatprep.mubr.msk.bf16.mxu0 %vm2863_vm0, %v2862_v1  ;;  %v369_v4 = vld [vmem:[%s323_s23] sm:$0xff]  ;;  %v370_v5 = vld [vmem:[%s323_s23 + $0x8] sm:$0xff]  ;;  %vm395_vm1 = vcmask 261120   ;;  %s2864_s27 = smov 88   ;;  %s2865_s10 = smov 96   ;;  %vm1392_vm2 = vcmask 64512  }
  0x6b   : > { %2455 = vmatprep.subr.bf16.mxu1 %v2862_v1  ;;  %2457 = vmatprep.mubr.msk.bf16.mxu1 %vm2863_vm0, %v2862_v1  ;;  %v371_v6 = vpack.c.bf16 %v370_v5, %v369_v4  ;;  %v2376_v7 = vld [vmem:[%s3461_s2] ss:$0 sm:$0xff]  ;;  %s2866_s14 = smov 80   ;;  %s2867_s15 = smov 72   ;;  %v2875_v18 = vmov 1983009808  }
  0x6c   : > { %2448 = vmatpush3.bf16.msra.mxu0 %v2630_v2  ;;  %s2868_s26 = smov 120   ;;  %s2869_s28 = smov 112   ;;  %v511_v19 = vunpack.c.l.s4 %v2875_v18  ;;  %v3125_v24 = vshrl.u32 %v513_v20, 7  ;;  %v2876_v25 = vmov 1934713408   ;;  %vm1581_vm3 = vcmask 130048  }
  0x6d   : > { %2449 = vmatprep.subr.bf16.mxu0 %v2862_v1  ;;  %s2870_s19 = smov 104   ;;  %s2871_s17 = smov 64   ;;  %v575_v26 = vunpack.c.l.s4 %v2876_v25  ;;  %vm2154_vm4 = vcmask 195584  }
  0x6e   : > { %s2872_s16 = smov 48   ;;  %s2873_s25 = smov 56   ;;  %v512_v23 = vunpack.c.0.s8 %v511_v19 }
  0x6f   : > { %s2874_s23 = smov 40   ;;  %v576_v34 = vunpack.c.0.s8 %v575_v26  ;;  %p3485_p0 = scmp.ne.s32.totalorder %s3477_s22, 0 }
  0x70   : > { %2450 = vmatpush3.bf16.msra.mxu0 %v2631_v3  ;;  %v3128_v31 = vsub.s32 %v512_v23, %v3125_v24 }
  0x71   : > { %2461 = vmatprep.subr.bf16.mxu0 %v2862_v1  ;;  %v3135_v41 = vsub.s32 %v576_v34, %v3125_v24 }
  0x73   : > { %2452 = vmatmul.mubr.msk.bf16.vlgmr.msra.gmra.mxu0 %vm395_vm1, %v371_v6 }
  0x74   : > { %2463 = vmatprep.mubr.msk.bf16.mxu0 %vm2863_vm0, %v2862_v1 }
 0x133   : > { %v433_v8 = vpop.f32.mrf.mxu0 }
 0x134   : > { %v3099_v9 = vadd.f32 %v2376_v7, %v433_v8 }
 0x135   : > { %v2453_v10 = vpop.f32.mrf.mxu0 }
 0x136   : > { %466 = vrot.lane.b32.xlu1 %v3099_v9, %s2864_s27  ;;  %460 = vrot.lane.b32.xlu0 %v3099_v9, %s2865_s10 }
 0x137   : > { %v436_v11 = vpop.f32.mrf.mxu0 }
 0x138   : > { %v3103_v12 = vadd.f32 %v2376_v7, %v436_v11 }
 0x139   : > { %v2454_v13 = vpop.f32.mrf.mxu0 }
 0x13a   : > { %472 = vrot.lane.b32.xlu0 %v3099_v9, %s2866_s14  ;;  %468 = vrot.lane.b32.xlu1 %v3103_v12, %s2864_s27  ;;  %s2879_s27 = smov 16  }
 0x13e   : > { %478 = vrot.lane.b32.xlu0 %v3099_v9, %s2867_s15  ;;  %474 = vrot.lane.b32.xlu1 %v3103_v12, %s2866_s14  ;;  %s2881_s14 = smov 24  }
 0x142   : > { %442 = vrot.lane.b32.xlu0 %v3099_v9, %s2868_s26  ;;  %480 = vrot.lane.b32.xlu1 %v3103_v12, %s2867_s15  ;;  %s367_s15 = scalar_lea.vmem [#allocation11], %s2371_s20  ;;  %s2246_s20 = scalar_lea.sflag [#allocation5], %s3067_s24 }
 0x146   : > { %444 = vrot.lane.b32.xlu1 %v3103_v12, %s2868_s26  ;;  %462 = vrot.lane.b32.xlu0 %v3103_v12, %s2865_s10  ;;  %s2880_s10 = smov 8   ;;  %s2259_s26 = sshll.u32 %s367_s15, 4  ;;  %s3409_s26 = int_to_ptr.vmem [resolvable:$true] %s2259_s26 }
 0x14a   : > { %450 = vrot.lane.b32.xlu1 %v3103_v12, %s2869_s28  ;;  %448 = vrot.lane.b32.xlu0 %v3099_v9, %s2869_s28  ;;  %s2424_s28 = sshll.u32 %s2953_s7, 8  ;;  %s2882_s7 = smov [#allocation11]  }
 0x14e   : > { %456 = vrot.lane.b32.xlu1 %v3103_v12, %s2870_s19  ;;  %454 = vrot.lane.b32.xlu0 %v3099_v9, %s2870_s19 }
 0x152   : > { %484 = vrot.lane.b32.xlu1 %v3099_v9, %s2871_s17  ;;  %496 = vrot.lane.b32.xlu0 %v3099_v9, %s2872_s16 }
 0x156   : > { %490 = vrot.lane.b32.xlu1 %v3099_v9, %s2873_s25  ;;  %502 = vrot.lane.b32.xlu0 %v3099_v9, %s2874_s23 }
 0x15a   : > { %492 = vrot.lane.b32.xlu1 %v3103_v12, %s2873_s25  ;;  %486 = vrot.lane.b32.xlu0 %v3103_v12, %s2871_s17  ;;  %s2780_s25 = scalar_lea.vmem %s3409_s26, 256 }
 0x15b   : > { %p2781_p12 = scmp.ne.s32.totalorder %s3409_s26, %s2780_s25 }
 0x15d   : > { %p2782_p5 = pnand %p2781_p12, %p3485_p0 }
 0x15e   : > { %498 = vrot.lane.b32.xlu1 %v3103_v12, %s2872_s16  ;;  %s3414_s16 = scalar_lea.hbm %s3467_s8, %s2424_s28 }
 0x15f   : > { %p2783_p3 = pneg %p2782_p5 }
 0x1a8   : > { %v467_v14 = vpop.permute.xlu1 %466  ;;  %v461_v15 = vpop.permute.xlu0 %460 }
 0x1ac   : > { %v473_v16 = vpop.permute.xlu0 %472  ;;  %v469_v17 = vpop.permute.xlu1 %468 }
 0x1ad   : > { %v540_v32 = vcombine.low %v461_v15, %v473_v16  ;;  %v541_v33 = vcombine.high %v461_v15, %v473_v16 }
 0x1af   : > { %v548_v39 = vrot.slane %v540_v32, %v3128_v31  ;;  %v555_v40 = vrot.slane %v541_v33, %v3128_v31 }
 0x1b0   : > { %v479_v21 = vpop.permute.xlu0 %478  ;;  %v475_v22 = vpop.permute.xlu1 %474 }
 0x1b1   : > { %v556_v27 = vcombine.low %v467_v14, %v479_v21  ;;  %v557_v28 = vcombine.high %v467_v14, %v479_v21 }
 0x1b3   : > { %v564_v35 = vrot.slane %v556_v27, %v3128_v31  ;;  %v571_v36 = vrot.slane %v557_v28, %v3128_v31 }
 0x1b4   : > { %v443_v29 = vpop.permute.xlu0 %442  ;;  %v481_v30 = vpop.permute.xlu1 %480 }
 0x1b5   : > { %v604_v42 = vcombine.low %v548_v39, %v564_v35  ;;  %v605_v43 = vcombine.high %v548_v39, %v564_v35  ;;  %v620_v45 = vcombine.low %v555_v40, %v571_v36  ;;  %v621_v46 = vcombine.high %v555_v40, %v571_v36 }
 0x1b6   : > { %v760_v49 = vcombine.low %v469_v17, %v481_v30  ;;  %v761_v51 = vcombine.high %v469_v17, %v481_v30 }
 0x1b7   : > { %v612_v52 = vrot.slane %v604_v42, %v3135_v41  ;;  %v619_v53 = vrot.slane %v605_v43, %v3135_v41  ;;  %v628_v55 = vrot.slane %v620_v45, %v3135_v41  ;;  %v635_v56 = vrot.slane %v621_v46, %v3135_v41 }
 0x1b8   : > { %v445_v37 = vpop.permute.xlu1 %444  ;;  %v463_v38 = vpop.permute.xlu0 %462  ;;  %v768_v59 = vrot.slane %v760_v49, %v3128_v31  ;;  %v775_v63 = vrot.slane %v761_v51, %v3128_v31 }
 0x1b9   : > { %v744_v44 = vcombine.low %v463_v38, %v475_v22  ;;  %v745_v50 = vcombine.high %v463_v38, %v475_v22  ;;  %v2381_v3 = vcombine.low %v612_v52, %v619_v53  ;;  %v2383_v7 = vcombine.high %v612_v52, %v619_v53 }
 0x1ba   : > { %v2385_v13 = vcombine.low %v628_v55, %v635_v56  ;;  %v2387_v17 = vcombine.high %v628_v55, %v635_v56 }
 0x1bb   : > { %v752_v54 = vrot.slane %v744_v44, %v3128_v31  ;;  %v759_v60 = vrot.slane %v745_v50, %v3128_v31  ;;  %v3157_v23 = vrot.slane %v2381_v3, %v3128_v31 }
 0x1bc   : > { %v451_v47 = vpop.permute.xlu1 %450  ;;  %v449_v48 = vpop.permute.xlu0 %448  ;;  %v3168_v40 = vrot.slane %v2385_v13, %v3128_v31  ;;  %v3171_v42 = vrot.slane %v2387_v17, %v3128_v31 }
 0x1bd   : > { %v508_v0 = vcombine.low %v3099_v9, %v449_v48  ;;  %v808_v4 = vcombine.low %v752_v54, %v768_v59  ;;  %v809_v5 = vcombine.high %v752_v54, %v768_v59  ;;  %v509_v6 = vcombine.high %v3099_v9, %v449_v48 }
 0x1be   : > { %v712_v8 = vcombine.low %v3103_v12, %v451_v47  ;;  %v824_v14 = vcombine.low %v759_v60, %v775_v63  ;;  %v825_v15 = vcombine.high %v759_v60, %v775_v63  ;;  %v713_v18 = vcombine.high %v3103_v12, %v451_v47 }
 0x1bf   : > { %v516_v19 = vrot.slane %v508_v0, %v3128_v31  ;;  %v816_v9 = vrot.slane %v808_v4, %v3135_v41  ;;  %v823_v21 = vrot.slane %v809_v5, %v3135_v41  ;;  %v523_v22 = vrot.slane %v509_v6, %v3128_v31 }
 0x1c0   : > { %v457_v57 = vpop.permute.xlu1 %456  ;;  %v455_v58 = vpop.permute.xlu0 %454  ;;  %v720_v25 = vrot.slane %v712_v8, %v3128_v31  ;;  %v839_v30 = vrot.slane %v825_v15, %v3135_v41  ;;  %v727_v34 = vrot.slane %v713_v18, %v3128_v31  ;;  %v1028_v54 = vcombine.low %v3168_v40, %v3171_v42 }
 0x1c1   : > { %v524_v61 = vcombine.low %v443_v29, %v455_v58  ;;  %v525_v62 = vcombine.high %v443_v29, %v455_v58  ;;  %v728_v2 = vcombine.low %v445_v37, %v457_v57  ;;  %v729_v10 = vcombine.high %v445_v37, %v457_v57 }
 0x1c2   : > { %v832_v29 = vrot.slane %v824_v14, %v3135_v41  ;;  %v3165_v37 = vrot.slane %v2383_v7, %v3128_v31  ;;  %v2389_v38 = vcombine.low %v816_v9, %v823_v21  ;;  %v2391_v39 = vcombine.high %v816_v9, %v823_v21 }
 0x1c3   : > { %v532_v11 = vrot.slane %v524_v61, %v3128_v31  ;;  %v539_v16 = vrot.slane %v525_v62, %v3128_v31  ;;  %v736_v20 = vrot.slane %v728_v2, %v3128_v31  ;;  %v743_v26 = vrot.slane %v729_v10, %v3128_v31 }
 0x1c4   : > { %v2393_v47 = vcombine.low %v832_v29, %v839_v30  ;;  %v2395_v48 = vcombine.high %v832_v29, %v839_v30  ;;  %v996_v53 = vcombine.low %v3157_v23, %v3165_v37  ;;  %v3184_v55 = vrot.slane %v2389_v38, %v3128_v31 }
 0x1c5   : > { %v572_v27 = vcombine.low %v516_v19, %v532_v11  ;;  %v573_v28 = vcombine.high %v516_v19, %v532_v11  ;;  %v588_v32 = vcombine.low %v523_v22, %v539_v16  ;;  %v589_v33 = vcombine.high %v523_v22, %v539_v16 }
 0x1c6   : > { %v776_v35 = vcombine.low %v720_v25, %v736_v20  ;;  %v777_v36 = vcombine.high %v720_v25, %v736_v20  ;;  %v792_v43 = vcombine.low %v727_v34, %v743_v26  ;;  %v793_v44 = vcombine.high %v727_v34, %v743_v26 }
 0x1c7   : > { %v580_v45 = vrot.slane %v572_v27, %v3135_v41  ;;  %v587_v46 = vrot.slane %v573_v28, %v3135_v41  ;;  %v596_v49 = vrot.slane %v588_v32, %v3135_v41  ;;  %v603_v50 = vrot.slane %v589_v33, %v3135_v41 }
 0x1c8   : > { %v784_v51 = vrot.slane %v776_v35, %v3135_v41  ;;  %v791_v52 = vrot.slane %v777_v36, %v3135_v41  ;;  %v1083_v56 = vrot.slane %v2391_v39, %v3128_v31  ;;  %v800_v57 = vrot.slane %v792_v43, %v3135_v41 }
 0x1c9   : > { %v807_v58 = vrot.slane %v793_v44, %v3135_v41  ;;  %v2380_v59 = vcombine.low %v580_v45, %v587_v46  ;;  %v2382_v60 = vcombine.high %v580_v45, %v587_v46  ;;  %v2384_v61 = vcombine.low %v596_v49, %v603_v50 }
 0x1ca   : > { %v2386_v62 = vcombine.high %v596_v49, %v603_v50  ;;  %v1099_v63 = vrot.slane %v2393_v47, %v3128_v31  ;;  %v1115_v0 = vrot.slane %v2395_v48, %v3128_v31  ;;  %v2388_v2 = vcombine.low %v784_v51, %v791_v52 }
 0x1cb   : > { %v2390_v3 = vcombine.high %v784_v51, %v791_v52  ;;  %v1004_v4 = vrot.slane %v996_v53, %v3135_v41  ;;  %v1036_v5 = vrot.slane %v1028_v54, %v3135_v41  ;;  %v1132_v6 = vcombine.low %v3184_v55, %v1083_v56 }
 0x1cc   : > { %v1164_v7 = vcombine.low %v1099_v63, %v1115_v0  ;;  %v2392_v8 = vcombine.low %v800_v57, %v807_v58  ;;  %v2394_v10 = vcombine.high %v800_v57, %v807_v58  ;;  %v924_v11 = vrot.slane %v2380_v59, %v3128_v31 }
 0x1cd   : > { %v940_v13 = vrot.slane %v2382_v60, %v3128_v31  ;;  %v956_v14 = vrot.slane %v2384_v61, %v3128_v31  ;;  %v972_v15 = vrot.slane %v2386_v62, %v3128_v31  ;;  %v1140_v16 = vrot.slane %v1132_v6, %v3135_v41 }
 0x1ce   : > { %v1172_v17 = vrot.slane %v1164_v7, %v3135_v41  ;;  %v1048_v18 = vcombine.low %v1004_v4, %v1036_v5  ;;  %v1049_v20 = vcombine.high %v1004_v4, %v1036_v5  ;;  %v1060_v21 = vrot.slane %v2388_v2, %v3128_v31 }
 0x1cf   : > { %v1076_v22 = vrot.slane %v2390_v3, %v3128_v31  ;;  %v1092_v25 = vrot.slane %v2392_v8, %v3128_v31  ;;  %v1108_v26 = vrot.slane %v2394_v10, %v3128_v31  ;;  %v980_v29 = vcombine.low %v924_v11, %v940_v13 }
 0x1d0   : > { %v1184_v19 = vcombine.low %v1140_v16, %v1172_v17  ;;  %v1185_v9 = vcombine.high %v1140_v16, %v1172_v17  ;;  %v1012_v30 = vcombine.low %v956_v14, %v972_v15  ;;  %v997_v39 = vcombine.high %v3157_v23, %v3165_v37 }
 0x1d1   : > { %v988_v34 = vrot.slane %v980_v29, %v3135_v41  ;;  %v1116_v36 = vcombine.low %v1060_v21, %v1076_v22  ;;  %v1148_v38 = vcombine.low %v1092_v25, %v1108_v26  ;;  %v1117_v43 = vcombine.high %v1060_v21, %v1076_v22 }
 0x1d2   : > { %v1388_v27 = vpack.c.bf16 %v1184_v19, %v1048_v18  ;;  %v1389_v28 = vpack.c.bf16 %v1185_v9, %v1049_v20  ;;  %v1020_v35 = vrot.slane %v1012_v30, %v3135_v41  ;;  %v1029_v45 = vcombine.high %v3168_v40, %v3171_v42 }
 0x1d3   : > { %v1124_v47 = vrot.slane %v1116_v36, %v3135_v41  ;;  %v1156_v48 = vrot.slane %v1148_v38, %v3135_v41  ;;  %v1133_v49 = vcombine.high %v3184_v55, %v1083_v56  ;;  %v981_v50 = vcombine.high %v924_v11, %v940_v13 }
 0x1d4   : > { %v1397_v32 = vsel %vm1392_vm2, %v1388_v27, 0  ;;  %v1444_v33 = vsel %vm1392_vm2, %v1389_v28, 0  ;;  %v1044_v44 = vcombine.low %v988_v34, %v1020_v35  ;;  %v1045_v46 = vcombine.high %v988_v34, %v1020_v35 }
 0x1d5   : > { %2456 = vmatpush3.bf16.xpose.msra.mxu1 %v1397_v32  ;;  %2462 = vmatpush3.bf16.xpose.msra.mxu0 %v1444_v33  ;;  %v1011_v51 = vrot.slane %v997_v39, %v3135_v41  ;;  %v1043_v23 = vrot.slane %v1029_v45, %v3135_v41  ;;  %v1165_v37 = vcombine.high %v1099_v63, %v1115_v0  ;;  %v1324_v45 = vld [vmem:[%s3465_s6] sm:$0xf] }
 0x1d6   : > { %2467 = vmatprep.subr.bf16.mxu1 %v2862_v1  ;;  %2473 = vmatprep.subr.bf16.mxu0 %v2862_v1  ;;  %v1013_v52 = vcombine.high %v956_v14, %v972_v15  ;;  %v1180_v53 = vcombine.low %v1124_v47, %v1156_v48  ;;  %v1181_v54 = vcombine.high %v1124_v47, %v1156_v48  ;;  %v485_v48 = vpop.permute.xlu1 %484 }
 0x1d7   : > { %v1147_v57 = vrot.slane %v1133_v49, %v3135_v41  ;;  %v1149_v58 = vcombine.high %v1092_v25, %v1108_v26  ;;  %v1179_v40 = vrot.slane %v1165_v37, %v3135_v41  ;;  %v1050_v60 = vcombine.low %v1011_v51, %v1043_v23  ;;  %v497_v49 = vpop.permute.xlu0 %496 }
 0x1d8   : > { %v1384_v42 = vpack.c.bf16 %v1180_v53, %v1044_v44  ;;  %v1385_v59 = vpack.c.bf16 %v1181_v54, %v1045_v46  ;;  %v1051_v62 = vcombine.high %v1011_v51, %v1043_v23  ;;  %v1131_v56 = vrot.slane %v1117_v43, %v3135_v41 }
 0x1d9   : > { %v1186_v61 = vcombine.low %v1147_v57, %v1179_v40  ;;  %v1187_v55 = vcombine.high %v1147_v57, %v1179_v40  ;;  %v995_v2 = vrot.slane %v981_v50, %v3135_v41  ;;  %v1027_v63 = vrot.slane %v1013_v52, %v3135_v41 }
 0x1da   : > { %v1163_v0 = vrot.slane %v1149_v58, %v3135_v41  ;;  %v2400_v46 = vmul.f32 -1.442695, %v1324_v45  ;;  %v491_v51 = vpop.permute.xlu1 %490  ;;  %v2877_v52 = vmov 1966171168   ;;  %v644_v53 = vcombine.low %v485_v48, %v497_v49 }
 0x1db   : > { %v1390_v3 = vpack.c.bf16 %v1186_v61, %v1050_v60  ;;  %v1391_v4 = vpack.c.bf16 %v1187_v55, %v1051_v62  ;;  %v1046_v7 = vcombine.low %v995_v2, %v1027_v63  ;;  %v1047_v10 = vcombine.high %v995_v2, %v1027_v63  ;;  %v503_v23 = vpop.permute.xlu0 %502 }
 0x1dc   : > { %2458 = vmatmul.mubr.msk.bf16.vlgmr.msra.gmra.mxu1 %vm1392_vm2, %v1384_v42  ;;  %2464 = vmatmul.mubr.msk.bf16.vlgmr.msra.gmra.mxu0 %vm1392_vm2, %v1385_v59  ;;  %v1182_v8 = vcombine.low %v1131_v56, %v1163_v0  ;;  %v1183_v11 = vcombine.high %v1131_v56, %v1163_v0  ;;  %2634 = vpow2.f32 %v2400_v46  ;;  %v660_v37 = vcombine.low %v491_v51, %v503_v23 }
 0x1dd   : > { %2469 = vmatprep.mubr.msk.bf16.mxu1 %vm2863_vm0, %v2862_v1  ;;  %2475 = vmatprep.mubr.msk.bf16.mxu0 %vm2863_vm0, %v2862_v1  ;;  %v1491_v5 = vsel %vm1392_vm2, %v1390_v3, 0  ;;  %v1538_v6 = vsel %vm1392_vm2, %v1391_v4, 0  ;;  %v661_v54 = vcombine.high %v491_v51, %v503_v23  ;;  %v645_v57 = vcombine.high %v485_v48, %v497_v49 }
 0x1de   : > { %2468 = vmatpush3.bf16.xpose.msra.mxu1 %v1491_v5  ;;  %2474 = vmatpush3.bf16.xpose.msra.mxu0 %v1538_v6  ;;  %v1386_v13 = vpack.c.bf16 %v1182_v8, %v1046_v7  ;;  %v1387_v14 = vpack.c.bf16 %v1183_v11, %v1047_v10  ;;  %v668_v58 = vrot.slane %v660_v37, %v3128_v31  ;;  %v493_v60 = vpop.permute.xlu1 %492  ;;  %v3295_v46 = vsub.s32 0, %v3125_v24 }
 0x1df   : > { %2479 = vmatprep.subr.bf16.mxu1 %v2862_v1  ;;  %2485 = vmatprep.subr.bf16.mxu0 %v2862_v1  ;;  %v652_v42 = vrot.slane %v644_v53, %v3128_v31  ;;  %v675_v59 = vrot.slane %v661_v54, %v3128_v31  ;;  %v659_v61 = vrot.slane %v645_v57, %v3128_v31  ;;  %v487_v56 = vpop.permute.xlu0 %486 }
 0x1e1   : > { %v676_v62 = vcombine.low %v652_v42, %v668_v58  ;;  %v677_v55 = vcombine.high %v652_v42, %v668_v58  ;;  %v692_v0 = vcombine.low %v659_v61, %v675_v59  ;;  %v693_v3 = vcombine.high %v659_v61, %v675_v59 }
 0x1e2   : > { %v499_v6 = vpop.permute.xlu1 %498 }
 0x1e3   : > { %v684_v4 = vrot.slane %v676_v62, %v3135_v41  ;;  %v691_v5 = vrot.slane %v677_v55, %v3135_v41  ;;  %v700_v11 = vrot.slane %v692_v0, %v3135_v41 }
 0x1e5   : > { %2470 = vmatmul.mubr.msk.bf16.vlgmr.msra.gmra.mxu1 %vm1392_vm2, %v1386_v13  ;;  %2476 = vmatmul.mubr.msk.bf16.vlgmr.msra.gmra.mxu0 %vm1392_vm2, %v1387_v14  ;;  %v707_v13 = vrot.slane %v693_v3, %v3135_v41 }
 0x1e6   : > { %2481 = vmatprep.mubr.msk.bf16.mxu1 %vm2863_vm0, %v2862_v1  ;;  %2487 = vmatprep.mubr.msk.bf16.mxu0 %vm2863_vm0, %v2862_v1 }
 0x1e9   : > { %v2635_v47 = vpop.eup %2634 }
 0x1ea   : > { %v1328_v50 = vadd.f32 1.0, %v2635_v47 }
 0x1ec   : > { %2636 = vrcp.f32 %v1328_v50 }
 0x1f9   : > { %v2637_v63 = vpop.eup %2636 }
 0x29c   : > { %v3241_v15 = vpop.f32.mrf.mxu1  ;;  %v3243_v16 = vpop.f32.mrf.mxu0 }
 0x29d   : > { %v1582_v17 = vsel %vm1581_vm3, %v3241_v15, -inf  ;;  %v1588_v22 = vsel %vm1581_vm3, %v3243_v16, -inf }
 0x29e   : > { %1583 = vmax.xlane.f32.xlu0 %v1582_v17  ;;  %v2459_v18 = vpop.f32.mrf.mxu1  ;;  %v2465_v19 = vpop.f32.mrf.mxu0  ;;  %v1188_v17 = vcombine.low %v684_v4, %v691_v5 }
 0x29f   : > { %v848_v18 = vcombine.low %v487_v56, %v499_v6 }
 0x2a0   : > { %v3247_v20 = vpop.f32.mrf.mxu1  ;;  %v3249_v9 = vpop.f32.mrf.mxu0 }
 0x2a1   : > { %v1585_v21 = vsel %vm1581_vm3, %v3247_v20, -inf  ;;  %v1591_v27 = vsel %vm1581_vm3, %v3249_v9, -inf }
 0x2a2   : > { %1586 = vmax.xlane.f32.xlu1 %v1585_v21  ;;  %v2460_v25 = vpop.f32.mrf.mxu1  ;;  %1589 = vmax.xlane.f32.xlu0 %v1588_v22  ;;  %v2466_v26 = vpop.f32.mrf.mxu0 }
 0x2a5   : > { %v3257_v28 = vpop.f32.mrf.mxu1  ;;  %v3259_v29 = vpop.f32.mrf.mxu0 }
 0x2a6   : > { %1592 = vmax.xlane.f32.xlu0 %v1591_v27  ;;  %v1594_v33 = vsel %vm1581_vm3, %v3257_v28, -inf  ;;  %v1600_v39 = vsel %vm1581_vm3, %v3259_v29, -inf  ;;  %v2396_v27 = vcombine.high %v684_v4, %v691_v5 }
 0x2a7   : > { %v2471_v30 = vpop.f32.mrf.mxu1  ;;  %v2477_v32 = vpop.f32.mrf.mxu0 }
 0x2a8   : > { %v1204_v30 = vcombine.low %v700_v11, %v707_v13  ;;  %v2397_v32 = vcombine.high %v700_v11, %v707_v13  ;;  %v1203_v49 = vrot.slane %v2396_v27, %v3128_v31 }
 0x2a9   : > { %v3263_v34 = vpop.f32.mrf.mxu1  ;;  %v3265_v35 = vpop.f32.mrf.mxu0 }
 0x2aa   : > { %1595 = vmax.xlane.f32.xlu0 %v1594_v33  ;;  %v1603_v43 = vsel %vm1581_vm3, %v3265_v35, -inf  ;;  %v1597_v44 = vsel %vm1581_vm3, %v3263_v34, -inf  ;;  %v849_v33 = vcombine.high %v487_v56, %v499_v6  ;;  %v1211_v50 = vrot.slane %v1204_v30, %v3128_v31 }
 0x2ab   : > { %v2472_v36 = vpop.f32.mrf.mxu1  ;;  %v2478_v38 = vpop.f32.mrf.mxu0  ;;  %v1219_v51 = vrot.slane %v2397_v32, %v3128_v31 }
 0x2ac   : > { %v863_v23 = vrot.slane %v849_v33, %v3128_v31 }
 0x2ad   : > { %v1237_v0 = vcombine.high %v1211_v50, %v1219_v51 }
 0x2ae   : > { %1601 = vmax.xlane.f32.xlu0 %v1600_v39  ;;  %v1195_v39 = vrot.slane %v1188_v17, %v3128_v31 }
 0x2b0   : > { %v1220_v59 = vcombine.low %v1195_v39, %v1203_v49 }
 0x2b2   : > { %1604 = vmax.xlane.f32.xlu0 %v1603_v43  ;;  %v856_v43 = vrot.slane %v848_v18, %v3128_v31  ;;  %v1228_v13 = vrot.slane %v1220_v59, %v3135_v41 }
 0x2b3   : > { %504 = vrot.lane.b32.xlu1 %v3103_v12, %s2874_s23  ;;  %v1333_v12 = vunpack.c.l.s4 %v2877_v52  ;;  %s2784_s23 = sshll.u32 %s2882_s7, 4  ;;  %s2785_s23 = int_to_ptr.vmem [resolvable:$false] %s2784_s23 }
 0x2b4   : > { %s2786_s11 = scalar_lea.vmem %s2785_s23, 512  ;;  %p2787_p10 = scmp.lt.s32.totalorder %s3409_s26, %s2785_s23 }
 0x2b5   : > { %v1334_v40 = vunpack.c.0.s8 %v1333_v12  ;;  %p2788_p7 = scmp.lt.s32.totalorder %s2786_s11, %s2780_s25 }
 0x2b7   : > { %v1337_v2 = vsub.s32 %v1334_v40, %v3125_v24  ;;  %p2789_p9 = por %p2788_p7, %p2787_p10 }
 0x2b9   : > { %v1338_v8 = vrot.slane %v2637_v63, %v1337_v2  ;;  %v1221_v63 = vcombine.high %v1195_v39, %v1203_v49  ;;  %p2790_p2 = pnand %p2789_p9, %p2783_p3 }
 0x2bb   : > { %v1339_v22 = vcombine.high %v1338_v8, %v1338_v8  ;;  %v3290_v38 = vrot.slane %v1338_v8, %v1337_v2  ;;  %v1235_v27 = vrot.slane %v1221_v63, %v3135_v41 }
 0x2bd   : > { %v3308_v53 = vrot.slane %v3290_v38, %v3295_v46 }
 0x2d7   : > { %1598 = vmax.xlane.f32.xlu1 %v1597_v44 }
 0x327   : > { %v1584_v7 = vpop.xlane.xlu0 %1583 }
 0x328   : > { %v1606_v10 = vsub.f32 %v3241_v15, %v1584_v7 }
 0x32a   : > { %v1614_v14 = vmul.f32 1.442695, %v1606_v10 }
 0x32b   : > { %v1587_v19 = vpop.xlane.xlu1 %1586  ;;  %v1590_v21 = vpop.xlane.xlu0 %1589 }
 0x32c   : > { %2638 = vpow2.f32 %v1614_v14  ;;  %v1607_v25 = vsub.f32 %v3247_v20, %v1587_v19  ;;  %v1608_v26 = vsub.f32 %v3243_v16, %v1590_v21  ;;  %v3297_v20 = vrot.slane %v1339_v22, %v1337_v2 }
 0x32e   : > { %v1616_v15 = vmul.f32 1.442695, %v1607_v25  ;;  %v1618_v36 = vmul.f32 1.442695, %v1608_v26  ;;  %v1355_v54 = vcombine.high %v3297_v20, %v3297_v20  ;;  %v1363_v5 = vrot.slane %v3297_v20, %v3295_v46 }
 0x32f   : > { %v505_v44 = vpop.permute.xlu1 %504  ;;  %v1593_v45 = vpop.xlane.xlu0 %1592 }
 0x330   : > { %2640 = vpow2.f32 %v1616_v15  ;;  %v864_v16 = vcombine.low %v493_v60, %v505_v44  ;;  %v865_v47 = vcombine.high %v493_v60, %v505_v44  ;;  %v1609_v48 = vsub.f32 %v3249_v9, %v1593_v45 }
 0x331   : > { %2642 = vpow2.f32 %v1618_v36  ;;  %v1354_v9 = vcombine.high %v3290_v38, %v3290_v38  ;;  %v1236_v60 = vcombine.low %v1211_v50, %v1219_v51 }
 0x332   : > { %v872_v37 = vrot.slane %v864_v16, %v3128_v31  ;;  %v879_v24 = vrot.slane %v865_v47, %v3128_v31  ;;  %v1620_v52 = vmul.f32 1.442695, %v1609_v48 }
 0x333   : > { %v1596_v12 = vpop.xlane.xlu0 %1595  ;;  %v1244_v14 = vrot.slane %v1236_v60, %v3135_v41 }
 0x334   : > { %v880_v57 = vcombine.low %v856_v43, %v872_v37  ;;  %v881_v58 = vcombine.high %v856_v43, %v872_v37  ;;  %v896_v40 = vcombine.low %v863_v23, %v879_v24  ;;  %v897_v42 = vcombine.high %v863_v23, %v879_v24 }
 0x335   : > { %2644 = vpow2.f32 %v1620_v52  ;;  %v1610_v61 = vsub.f32 %v3257_v28, %v1596_v12  ;;  %v1252_v39 = vcombine.low %v1228_v13, %v1244_v14  ;;  %v1367_v43 = vrot.slane %v1354_v9, %v3295_v46 }
 0x336   : > { %v888_v62 = vrot.slane %v880_v57, %v3135_v41  ;;  %v895_v55 = vrot.slane %v881_v58, %v3135_v41  ;;  %v904_v56 = vrot.slane %v896_v40, %v3135_v41  ;;  %v911_v2 = vrot.slane %v897_v42, %v3135_v41 }
 0x337   : > { %v1622_v3 = vmul.f32 1.442695, %v1610_v61  ;;  %v1602_v4 = vpop.xlane.xlu0 %1601  ;;  %v1253_v47 = vcombine.high %v1228_v13, %v1244_v14  ;;  %v1371_v24 = vrot.slane %v1355_v54, %v3295_v46  ;;  %v1376_v58 = vmul.f32 %v3308_v53, %v1252_v39 }
 0x338   : > { %v1256_v6 = vcombine.low %v888_v62, %v895_v55  ;;  %v2398_v7 = vcombine.high %v888_v62, %v895_v55  ;;  %v1272_v8 = vcombine.low %v904_v56, %v911_v2  ;;  %v2399_v10 = vcombine.high %v904_v56, %v911_v2 }
 0x339   : > { %v3321_v28 = vpop.eup %2638  ;;  %2646 = vpow2.f32 %v1622_v3  ;;  %v1612_v11 = vsub.f32 %v3259_v29, %v1602_v4  ;;  %v1251_v29 = vrot.slane %v1237_v0, %v3135_v41  ;;  %v1378_v42 = vmul.f32 %v1363_v5, %v1253_v47 }
 0x33a   : > { %v1263_v17 = vrot.slane %v1256_v6, %v3128_v31  ;;  %v1271_v18 = vrot.slane %v2398_v7, %v3128_v31  ;;  %v1279_v19 = vrot.slane %v1272_v8, %v3128_v31  ;;  %v1287_v21 = vrot.slane %v2399_v10, %v3128_v31 }
 0x33b   : > { %v1626_v22 = vmul.f32 1.442695, %v1612_v11  ;;  %v1630_v25 = vsel %vm1581_vm3, %v3321_v28, 0.0  ;;  %v1605_v26 = vpop.xlane.xlu0 %1604  ;;  %v1254_v37 = vcombine.low %v1235_v27, %v1251_v29  ;;  %v1255_v12 = vcombine.high %v1235_v27, %v1251_v29 }
 0x33c   : > { %v1288_v30 = vcombine.low %v1263_v17, %v1271_v18  ;;  %v1289_v32 = vcombine.high %v1263_v17, %v1271_v18  ;;  %v1304_v33 = vcombine.low %v1279_v19, %v1287_v21  ;;  %v1305_v15 = vcombine.high %v1279_v19, %v1287_v21  ;;  %1631 = vadd.xlane.f32.xlu1 %v1630_v25 }
 0x33d   : > { %v2641_v36 = vpop.eup %2640  ;;  %2648 = vpow2.f32 %v1626_v22  ;;  %v1613_v38 = vsub.f32 %v3265_v35, %v1605_v26  ;;  %v1380_v54 = vmul.f32 %v1367_v43, %v1254_v37  ;;  %v1382_v63 = vmul.f32 %v1371_v24, %v1255_v12 }
 0x33e   : > { %v2643_v44 = vpop.eup %2642  ;;  %v1633_v45 = vsel %vm1581_vm3, %v2641_v36, 0.0  ;;  %v1296_v20 = vrot.slane %v1288_v30, %v3135_v41  ;;  %v1312_v16 = vrot.slane %v1304_v33, %v3135_v41  ;;  %v1303_v50 = vrot.slane %v1289_v32, %v3135_v41 }
 0x33f   : > { %v1628_v48 = vmul.f32 1.442695, %v1613_v38  ;;  %v1636_v49 = vsel %vm1581_vm3, %v2643_v44, 0.0  ;;  %1634 = vadd.xlane.f32.xlu0 %v1633_v45  ;;  %v1319_v51 = vrot.slane %v1305_v15, %v3135_v41  ;;  %v1654_v3 = vpack.c.bf16 %v2641_v36, %v3321_v28 }
 0x340   : > { %1637 = vadd.xlane.f32.xlu1 %v1636_v49  ;;  %v1320_v35 = vcombine.low %v1296_v20, %v1312_v16  ;;  %v1321_v23 = vcombine.high %v1296_v20, %v1312_v16 }
 0x341   : > { %2650 = vpow2.f32 %v1628_v48  ;;  %v1322_v52 = vcombine.low %v1303_v50, %v1319_v51  ;;  %v1323_v9 = vcombine.high %v1303_v50, %v1319_v51 }
 0x342   : > { %v2645_v57 = vpop.eup %2644  ;;  %v1377_v40 = vmul.f32 %v3308_v53, %v1320_v35  ;;  %v1379_v59 = vmul.f32 %v1363_v5, %v1321_v23 }
 0x343   : > { %v1639_v60 = vsel %vm1581_vm3, %v2645_v57, 0.0  ;;  %v1381_v55 = vmul.f32 %v1367_v43, %v1322_v52  ;;  %v1383_v56 = vmul.f32 %v1371_v24, %v1323_v9  ;;  %v1655_v4 = vpack.c.bf16 %v2645_v57, %v2643_v44 }
 0x344   : > { %1640 = vadd.xlane.f32.xlu0 %v1639_v60  ;;  %v1658_v61 = vpack.c.bf16 %v1377_v40, %v1376_v58  ;;  %v1659_v62 = vpack.c.bf16 %v1379_v59, %v1378_v42 }
 0x345   : > { %v1660_v53 = vpack.c.bf16 %v1381_v55, %v1380_v54  ;;  %v1661_v5 = vpack.c.bf16 %v1383_v56, %v1382_v63 }
 0x346   : > { %v2647_v2 = vpop.eup %2646  ;;  %2480 = vmatpush3.bf16.msra.mxu1 %v1658_v61  ;;  %2486 = vmatpush3.bf16.msra.mxu0 %v1659_v62 }
 0x347   : > { %v1642_v0 = vsel %vm1581_vm3, %v2647_v2, 0.0  ;;  %2491 = vmatprep.subr.bf16.mxu1 %v2862_v1  ;;  %2497 = vmatprep.subr.bf16.mxu0 %v2862_v1 }
 0x348   : > { %1643 = vadd.xlane.f32.xlu1 %v1642_v0 }
 0x349   : > { %2482 = vmatmul.mubr.msk.bf16.vlgmr.msra.gmra.mxu1 %vm1581_vm3, %v1654_v3  ;;  %2488 = vmatmul.mubr.msk.bf16.vlgmr.msra.gmra.mxu0 %vm1581_vm3, %v1655_v4 }
 0x34a   : > { %v2649_v6 = vpop.eup %2648  ;;  %2492 = vmatpush3.bf16.msra.mxu1 %v1660_v53  ;;  %2498 = vmatpush3.bf16.msra.mxu0 %v1661_v5 }
 0x34b   : > { %v1648_v7 = vsel %vm1581_vm3, %v2649_v6, 0.0  ;;  %2499 = vmatprep.mubr.msk.bf16.mxu0 %vm2863_vm0, %v2862_v1  ;;  %2493 = vmatprep.mubr.msk.bf16.mxu1 %vm2863_vm0, %v2862_v1 }
 0x34c   : > { %1649 = vadd.xlane.f32.xlu1 %v1648_v7  ;;  %2503 = vmatprep.subr.bf16.mxu1 %v2862_v1 }
 0x34e   : > { %v2651_v8 = vpop.eup %2650 }
 0x34f   : > { %v1657_v10 = vpack.c.bf16 %v2651_v8, %v2649_v6  ;;  %v1651_v19 = vsel %vm1581_vm3, %v2651_v8, 0.0 }
 0x351   : > { %2500 = vmatmul.mubr.msk.bf16.vlgmr.msra.gmra.mxu0 %vm1581_vm3, %v1657_v10 }
 0x360   : > { %v1599_v28 = vpop.xlane.xlu1 %1598 }
 0x361   : > { %v1611_v11 = vsub.f32 %v3263_v34, %v1599_v28 }
 0x363   : > { %v1624_v13 = vmul.f32 1.442695, %v1611_v11 }
 0x365   : > { %2652 = vpow2.f32 %v1624_v13 }
 0x372   : > { %v2653_v14 = vpop.eup %2652 }
 0x373   : > { %v1645_v17 = vsel %vm1581_vm3, %v2653_v14, 0.0  ;;  %v1656_v18 = vpack.c.bf16 %v2653_v14, %v2647_v2 }
 0x374   : > { %1646 = vadd.xlane.f32.xlu0 %v1645_v17 }
 0x375   : > { %2494 = vmatmul.mubr.msk.bf16.vlgmr.msra.gmra.mxu1 %vm1581_vm3, %v1656_v18 }
 0x376   : > { %2507 = vmatprep.mubr.msk.bf16.mxu1 %vm2863_vm0, %v2862_v1 }
 0x378   : > { %1652 = vadd.xlane.f32.xlu0 %v1651_v19 }
 0x3c5   : > { %v1632_v32 = vpop.xlane.xlu1 %1631 }
 0x3c8   : > { %v1635_v39 = vpop.xlane.xlu0 %1634 }
 0x3c9   : > { %v1638_v38 = vpop.xlane.xlu1 %1637 }
 0x3cd   : > { %v1641_v45 = vpop.xlane.xlu0 %1640 }
 0x3d1   : > { %v1644_v44 = vpop.xlane.xlu1 %1643 }
 0x3d5   : > { %v1650_v20 = vpop.xlane.xlu1 %1649 }
 0x3d6   : > { %2654 = vrcp.f32 %v1650_v20 }
 0x3d7   : > { %2656 = vrcp.f32 %v1638_v38 }
 0x3d8   : > { %2658 = vrcp.f32 %v1632_v32 }
 0x3d9   : > { %2660 = vrcp.f32 %v1644_v44 }
 0x3e3   : > { %v2655_v48 = vpop.eup %2654 }
 0x3e4   : > { %v2657_v50 = vpop.eup %2656 }
 0x3e5   : > { %v2659_v35 = vpop.eup %2658 }
 0x3e6   : > { %v2661_v23 = vpop.eup %2660 }
 0x3fd   : > { %v1647_v16 = vpop.xlane.xlu0 %1646 }
 0x401   : > { %v1653_v47 = vpop.xlane.xlu0 %1652 }
 0x402   : > { %2662 = vrcp.f32 %v1653_v47 }
 0x403   : > { %2664 = vrcp.f32 %v1641_v45 }
 0x404   : > { %2666 = vrcp.f32 %v1647_v16 }
 0x405   : > { %2668 = vrcp.f32 %v1635_v39 }
 0x409   : > { %v1699_v21 = vpop.f32.mrf.mxu1  ;;  %v1743_v22 = vpop.f32.mrf.mxu0 }
 0x40a   : > { %v1848_v51 = vmul.f32 %v2657_v50, %v1743_v22  ;;  %v1846_v12 = vmul.f32 %v2659_v35, %v1699_v21 }
 0x40b   : > { %v2483_v25 = vpop.f32.mrf.mxu1  ;;  %v2489_v26 = vpop.f32.mrf.mxu0 }
 0x40d   : > { %v1702_v34 = vpop.f32.mrf.mxu1  ;;  %v1746_v27 = vpop.f32.mrf.mxu0 }
 0x40f   : > { %v2484_v29 = vpop.f32.mrf.mxu1  ;;  %v2490_v30 = vpop.f32.mrf.mxu0 }
 0x410   : > { %v2663_v52 = vpop.eup %2662 }
 0x411   : > { %v1831_v33 = vpop.f32.mrf.mxu0  ;;  %v2665_v42 = vpop.eup %2664 }
 0x412   : > { %v1852_v49 = vmul.f32 %v2655_v48, %v1831_v33  ;;  %v2667_v61 = vpop.eup %2666  ;;  %v1849_v62 = vmul.f32 %v2665_v42, %v1746_v27 }
 0x413   : > { %v2501_v15 = vpop.f32.mrf.mxu0  ;;  %v2669_v2 = vpop.eup %2668 }
 0x414   : > { %v1870_v37 = vcombine.low %v1848_v51, %v1852_v49  ;;  %v1871_v9 = vcombine.high %v1848_v51, %v1852_v49  ;;  %v1847_v4 = vmul.f32 %v2669_v2, %v1702_v34 }
 0x415   : > { %v1834_v36 = vpop.f32.mrf.mxu0 }
 0x416   : > { %v1853_v58 = vmul.f32 %v2663_v52, %v1834_v36  ;;  %v1878_v55 = vrot.slane %v1870_v37, %v3128_v31  ;;  %v1885_v54 = vrot.slane %v1871_v9, %v3128_v31  ;;  %v2632_v9 = vld [vmem:[#allocation8 + $0x8] sm:$0xff]  }
 0x417   : > { %v2502_v43 = vpop.f32.mrf.mxu0  ;;  %2504 = vmatpush3.bf16.msra.mxu1 %v2632_v9 }
 0x418   : > { %v1938_v53 = vcombine.low %v1849_v62, %v1853_v58  ;;  %v1939_v5 = vcombine.high %v1849_v62, %v1853_v58  ;;  %2505 = vmatprep.subr.bf16.mxu1 %v2862_v1 }
 0x41a   : > { %v1946_v21 = vrot.slane %v1938_v53, %v3128_v31  ;;  %v1953_v22 = vrot.slane %v1939_v5, %v3128_v31 }
 0x435   : > { %v1787_v24 = vpop.f32.mrf.mxu1 }
 0x436   : > { %v1850_v57 = vmul.f32 %v2661_v23, %v1787_v24 }
 0x437   : > { %v2495_v40 = vpop.f32.mrf.mxu1 }
 0x438   : > { %v1854_v59 = vcombine.low %v1846_v12, %v1850_v57  ;;  %v1855_v60 = vcombine.high %v1846_v12, %v1850_v57 }
 0x439   : > { %v1790_v56 = vpop.f32.mrf.mxu1 }
 0x43a   : > { %v1862_v63 = vrot.slane %v1854_v59, %v3128_v31  ;;  %v1869_v0 = vrot.slane %v1855_v60, %v3128_v31  ;;  %v1851_v3 = vmul.f32 %v2667_v61, %v1790_v56 }
 0x43b   : > { %v2496_v6 = vpop.f32.mrf.mxu1 }
 0x43c   : > { %v1886_v7 = vcombine.low %v1862_v63, %v1878_v55  ;;  %v1887_v8 = vcombine.high %v1862_v63, %v1878_v55  ;;  %v1902_v10 = vcombine.low %v1869_v0, %v1885_v54  ;;  %v1903_v28 = vcombine.high %v1869_v0, %v1885_v54 }
 0x43d   : > { %v1922_v11 = vcombine.low %v1847_v4, %v1851_v3  ;;  %v1923_v13 = vcombine.high %v1847_v4, %v1851_v3  ;;  %v2633_v3 = vld [vmem:[#allocation8] sm:$0xff]  }
 0x43e   : > { %v1894_v14 = vrot.slane %v1886_v7, %v3135_v41  ;;  %v1901_v17 = vrot.slane %v1887_v8, %v3135_v41  ;;  %v1910_v18 = vrot.slane %v1902_v10, %v3135_v41  ;;  %v1917_v19 = vrot.slane %v1903_v28, %v3135_v41  ;;  %2506 = vmatpush3.bf16.msra.mxu1 %v2633_v3  ;;  %v2225_v8 = vld [vmem:[#allocation2] sm:$0x1] }
 0x43f   : > { %v1930_v25 = vrot.slane %v1922_v11, %v3128_v31  ;;  %v1937_v26 = vrot.slane %v1923_v13, %v3128_v31  ;;  %v2417_v10 = vmul.f32 -1.442695, %v2225_v8  ;;  %v2878_v13 = vmov 0  }
 0x440   : > { %v1990_v34 = vcombine.low %v1894_v14, %v1901_v17  ;;  %v2409_v27 = vcombine.high %v1894_v14, %v1901_v17  ;;  %v2006_v29 = vcombine.low %v1910_v18, %v1917_v19  ;;  %v2410_v30 = vcombine.high %v1910_v18, %v1917_v19  ;;  %2628 = vset.pattern.permute.xlu1 %v2878_v13 }
 0x441   : > { %v1954_v32 = vcombine.low %v1930_v25, %v1946_v21  ;;  %v1955_v33 = vcombine.high %v1930_v25, %v1946_v21  ;;  %v1970_v15 = vcombine.low %v1937_v26, %v1953_v22  ;;  %v1971_v36 = vcombine.high %v1937_v26, %v1953_v22  ;;  %2629 = vset.pattern.permute.xlu0 %v2878_v13 }
 0x442   : > { %v1997_v38 = vrot.slane %v1990_v34, %v3128_v31  ;;  %v2005_v39 = vrot.slane %v2409_v27, %v3128_v31  ;;  %v2013_v43 = vrot.slane %v2006_v29, %v3128_v31  ;;  %v2021_v44 = vrot.slane %v2410_v30, %v3128_v31 }
 0x443   : > { %v1962_v45 = vrot.slane %v1954_v32, %v3135_v41  ;;  %v1969_v20 = vrot.slane %v1955_v33, %v3135_v41  ;;  %v1978_v16 = vrot.slane %v1970_v15, %v3135_v41  ;;  %v1985_v47 = vrot.slane %v1971_v36, %v3135_v41 }
 0x444   : > { %v2023_v48 = vcombine.high %v1997_v38, %v2005_v39  ;;  %v2039_v49 = vcombine.high %v2013_v43, %v2021_v44  ;;  %v2022_v50 = vcombine.low %v1997_v38, %v2005_v39  ;;  %v2038_v51 = vcombine.low %v2013_v43, %v2021_v44 }
 0x445   : > { %v2058_v35 = vcombine.low %v1962_v45, %v1969_v20  ;;  %v2411_v23 = vcombine.high %v1962_v45, %v1969_v20  ;;  %v2074_v37 = vcombine.low %v1978_v16, %v1985_v47  ;;  %v2412_v24 = vcombine.high %v1978_v16, %v1985_v47  ;;  %v2413_v45 = vld [vmem:[#allocation9] ss:$0 sm:$0xff] }
 0x446   : > { %v2030_v52 = vrot.slane %v2022_v50, %v3135_v41  ;;  %v2046_v12 = vrot.slane %v2038_v51, %v3135_v41  ;;  %v2037_v59 = vrot.slane %v2023_v48, %v3135_v41  ;;  %v2053_v60 = vrot.slane %v2039_v49, %v3135_v41 }
 0x447   : > { %v2065_v57 = vrot.slane %v2058_v35, %v3128_v31  ;;  %v2073_v58 = vrot.slane %v2411_v23, %v3128_v31  ;;  %v2081_v40 = vrot.slane %v2074_v37, %v3128_v31  ;;  %v2089_v42 = vrot.slane %v2412_v24, %v3128_v31 }
 0x448   : > { %v2054_v61 = vcombine.low %v2030_v52, %v2046_v12  ;;  %v2056_v4 = vcombine.low %v2037_v59, %v2053_v60  ;;  %v2055_v5 = vcombine.high %v2030_v52, %v2046_v12  ;;  %2670 = vpow2.f32 %v2417_v10 }
 0x449   : > { %v2091_v62 = vcombine.high %v2065_v57, %v2073_v58  ;;  %v2107_v55 = vcombine.high %v2081_v40, %v2089_v42  ;;  %v2090_v56 = vcombine.low %v2065_v57, %v2073_v58  ;;  %v2106_v2 = vcombine.low %v2081_v40, %v2089_v42 }
 0x44b   : > { %v2105_v54 = vrot.slane %v2091_v62, %v3135_v41  ;;  %v2121_v63 = vrot.slane %v2107_v55, %v3135_v41  ;;  %v2098_v0 = vrot.slane %v2090_v56, %v3135_v41  ;;  %v2114_v31 = vrot.slane %v2106_v2, %v3135_v41 }
 0x44c   : > { %v2057_v41 = vcombine.high %v2037_v59, %v2053_v60 }
 0x44d   : > { %v2124_v53 = vcombine.low %v2105_v54, %v2121_v63  ;;  %v2123_v6 = vcombine.high %v2098_v0, %v2114_v31  ;;  %v2122_v7 = vcombine.low %v2098_v0, %v2114_v31  ;;  %v2125_v1 = vcombine.high %v2105_v54, %v2121_v63 }
 0x44f   : > { %v2618_v28 = vpack.i.bf16 %v2124_v53, %v2056_v4  ;;  %v2613_v11 = vpack.i.bf16 %v2123_v6, %v2055_v5  ;;  %v2623_v14 = vpack.i.bf16 %v2125_v1, %v2057_v41 }
 0x451   : > { %2619 = vrot.lane.b32.xlu0 %v2618_v28, %s2879_s27  ;;  %2614 = vrot.lane.b32.xlu1 %v2613_v11, %s2880_s10 }
 0x455   : > { %2624 = vrot.lane.b32.xlu1 %v2623_v14, %s2881_s14  ;;  %v2671_v17 = vpop.eup %2670 }
 0x456   : > { %v2229_v18 = vadd.f32 1.0, %v2671_v17 }
 0x458   : > { %2672 = vrcp.f32 %v2229_v18 }
 0x465   : > { %v2673_v19 = vpop.eup %2672 }
 0x466   : > { %v2236_v21 = vrot.slane %v2673_v19, %v3295_v46 }
 0x468   : > { %2238 = vperm.xlu1 %2628, %v2236_v21  }
 0x4c3   : > { %v2620_v22 = vpop.permute.xlu0 %2619  ;;  %v2615_v25 = vpop.permute.xlu1 %2614 }
 0x4c4   : > { %v2617_v26 = vunpack.i.h.bf16 %v2615_v25  ;;  %v2616_v34 = vunpack.i.l.bf16 %v2615_v25  ;;  %v2622_v27 = vunpack.i.h.bf16 %v2620_v22  ;;  %v2621_v29 = vunpack.i.l.bf16 %v2620_v22 }
 0x4c6   : > { %v2150_v30 = vsel %vm1392_vm2, %v2054_v61, %v2616_v34  ;;  %v2151_v32 = vsel %vm1392_vm2, %v2122_v7, %v2617_v26 }
 0x4c7   : > { %v2625_v33 = vpop.permute.xlu1 %2624  ;;  %v2152_v38 = vsel %vm1581_vm3, %v2150_v30, %v2621_v29  ;;  %v2153_v46 = vsel %vm1581_vm3, %v2151_v32, %v2622_v27 }
 0x4c8   : > { %v2627_v15 = vunpack.i.h.bf16 %v2625_v33  ;;  %v2626_v36 = vunpack.i.l.bf16 %v2625_v33 }
 0x4ca   : > { %v2155_v39 = vsel %vm2154_vm4, %v2152_v38, %v2626_v36  ;;  %v2156_v43 = vsel %vm2154_vm4, %v2153_v46, %v2627_v15 }
 0x4cb   : > { %v2157_v44 = vpack.c.bf16 %v2156_v43, %v2155_v39 }
 0x4cd   : > { %2508 = vmatmul.mubr.msk.bf16.vlgmr.msra.gmra.mxu1 %vm395_vm1, %v2157_v44 }
 0x4e3   : > { %v2239_v16 = vpop.permute.xlu1 %2238 }
 0x58d   : > { %v2218_v20 = vpop.f32.mrf.mxu1 }
 0x58e   : > { %v2219_v47 = vadd.f32 %v2413_v45, %v2218_v20 }
 0x58f   : > { %v2509_v48 = vpop.f32.mrf.mxu1 }
 0x590   : > { %v2241_v49 = vmul.f32 %v2239_v16, %v2219_v47 }
 0x591   : > { %v2221_v50 = vpop.f32.mrf.mxu1 }
 0x592   : > { %2243 = vst.msk [vmem:[%s367_s15] sm:$0xff] %vm395_vm1, %v2241_v49  ;;  %v2222_v51 = vadd.f32 %v2413_v45, %v2221_v50 }
 0x593   : > { %v2510_v35 = vpop.f32.mrf.mxu1 }
 0x594   : > { %v2242_v23 = vmul.f32 %v2239_v16, %v2222_v51 }
 0x596   : > { %2244 = vst.msk [vmem:[%s367_s15 + $0x8] sm:$0xff] %vm395_vm1, %v2242_v23 }
 0x597   : > { %2793 = shalt.err (!%p2790_p2)
}
 0x598   : > { %s2794_s13 = scalar_lea.hbm %s3414_s16, 256  ;;  %s2798_s15 = scalar_lea.hbm %s3467_s8, 512 }
 0x599   : > { %p2795_p13 = scmp.ne.s32.totalorder %s3414_s16, %s2794_s13  ;;  %p2799_p1 = scmp.lt.s32.totalorder %s3414_s16, %s3467_s8 }
 0x59a   : > { %p2800_p11 = scmp.lt.s32.totalorder %s2798_s15, %s2794_s13 }
 0x59b   : > { %p2796_p4 = pnand %p2795_p13, %p3485_p0 }
 0x59c   : > { %p2801_p6 = por %p2800_p11, %p2799_p1 }
 0x59d   : > { %p2797_p8 = pneg %p2796_p4 }
 0x59f   : > { %p2802_p12 = pnand %p2801_p6, %p2797_p8 }
 0x5a1   : > { %2805 = shalt.err (!%p2802_p12)
}
 0x5a2   : > { %s2883_s17 = smov 128  }
 0x5a3   : > { %2525 = dma.vmem_to_hbm [thread:$0]  (%p3485_p0), %s3409_s26, 256, %s3414_s16, %s2246_s20, %s2883_s17, %s2883_s17, %s2880_s10  }
 0x5a4 PF: > { %s2274_s25 = sand.u32 1, %s2840_s5   ;;  %p3486_p5 = scmp.ne.s32.totalorder %s3473_s12, 0 }
 0x5a5   : > { %p3487_p3 = scmp.ge.s32.totalorder %s2852_s9, 2  ;;  %s2275_s7 = scalar_lea.sflag [#allocation5], %s2274_s25 }
 0x5a7   : > { %p2542_p10 = pnand %p3487_p3, %p3486_p5 }
 0x5a9   : > { %p2543_p7 = pneg %p2542_p10 }
 0x5ab   : > { %2835 = dma.done.wait (%p2543_p7), %s2275_s7, 256  }
 0x5ac   : > { %2837 = vsyncadd (%p2543_p7), %s2275_s7, 4294967040  ;;  %p25_p9 = scmp.ge.s32.totalorder %s3012_s18, 4   ;;  %s3488_s5 = smov %s2844_s29 }
 0x5ad   : > { %s3489_s29 = smov %s2848_s30  ;;  %s3490_s30 = smov %s3022_s21 }
 0x5ae   : > { %s3491_s9 = smov %s3012_s18  ;;  %27 = sbr.rel (!%p25_p9) target bundleno = 10 (0xa), region = 109 }
 0x5b3   :  { %2280 = vsyncpa [#allocation4], 1 }
 0x5b4   :  { %2282 = vsyncpa [#allocation4 + $0x1], 1 }
 0x5b5   :  { %2283 = vsyncpa [#allocation7], 1 }
 0x5b6   :  { %2284 = vsyncpa [#allocation10], 1 }
 0x5b7   :  { %2285 = vsyncpa [#allocation5], 1 }
 0x5b8   :  { %2287 = vsyncpa [#allocation5 + $0x1], 1 }

// kernel: tpu_custom_call.1
= control target key start
LH: loop header
LB: loop body
LE: loop exit
PB: predicated region body
PF: predicated region fallthrough
CT: control target
= control target key end

     0   :  { %s3459_s0 = inlined_call_operand.hbm [shape: f32[2,16,32], index: 0, kind: input, shape index: {}]   ;;  %s3460_s1 = inlined_call_operand.hbm [shape: bf16[32,96], index: 1, kind: input, shape index: {}]   ;;  %s3461_s2 = inlined_call_operand.vmem [shape: f32[1,96], index: 2, kind: input, shape index: {}]   ;;  %s3462_s3 = inlined_call_operand.hbm [shape: bf16[32,32], index: 3, kind: input, shape index: {}]   ;;  %s3463_s4 = inlined_call_operand.hbm [shape: f32[1,32], index: 4, kind: input, shape index: {}]   ;;  %s3464_s5 = inlined_call_operand.vmem [shape: f32[4,8], index: 5, kind: input, shape index: {}]   ;;  %s3465_s6 = inlined_call_operand.vmem [shape: f32[4,8], index: 6, kind: input, shape index: {}]   ;;  %s3466_s7 = inlined_call_operand.<no memory space> [shape: f32[1,1], index: 7, kind: input, shape index: {}]   ;;  %s3467_s8 = inlined_call_operand.hbm [shape: f32[2,16,32], index: 8, kind: output, shape index: {}]  }
   0x1   :  { %v13_v0 = vstv %s3466_s7 }
   0x2   :  { %14 = vst [vmem:[#allocation2] sm:$0x1] %v13_v0 }
   0x3   :  { %15 = vsyncpa [#allocation4], 0 }
   0x4   :  { %17 = vsyncpa [#allocation4 + $0x1], 0 }
   0x5   :  { %18 = vsyncpa [#allocation7], 0 }
   0x6   :  { %19 = vsyncpa [#allocation10], 0 }
   0x7   :  { %20 = vsyncpa [#allocation5], 0 }
   0x8   :  { %22 = vsyncpa [#allocation5 + $0x1], 0  ;;  %s2932_s5 = smov 0   ;;  %s2934_s29 = smov 0  }
   0x9   :  { %s2936_s30 = smov 0   ;;  %s2938_s9 = smov 0  }
   0xa LB: > { %s2953_s7 = sadd.s32 4294967295, %s2852_s9   ;;  %s2361_s10 = sadd.s32 4294967294, %s2852_s9   ;;  %s2852_s9 = sphi %s2938_s9, %s3491_s9   ;;  %s2848_s30 = sphi %s2936_s30, %s3490_s30   ;;  %s2844_s29 = sphi %s2934_s29, %s3489_s29   ;;  %s2840_s5 = sphi %s2932_s5, %s3488_s5  }
   0xb   : > { %p48_p0 = scmp.ne.s32.totalorder %s2844_s29, %s2840_s5  ;;  %p3468_p1 = scmp.eq.s32.totalorder %s2953_s7, 0 }
   0xc   : > { %p225_p3 = scmp.eq.s32.totalorder %s2361_s10, 1  ;;  %p2362_p5 = scmp.ge.s32.totalorder %s2852_s9, 1 }
   0xd   : > { %p2962_p4 = por %p3468_p1, %p48_p0  ;;  %p232_p7 = scmp.lt.s32.totalorder %s2852_s9, 3 }
   0xe   : > { %p2967_p6 = por %p225_p3, %p48_p0  ;;  %s2854_s14 = smov [#allocation6]  }
   0xf   : > { %s3472_s11 = scalar_select %p2962_p4, 1, 0 }
  0x10   : > { %s3473_s12 = scalar_select %p2967_p6, 1, 0 }
  0x11   : > { %p2972_p8 = pnand %p2362_p5, %p232_p7  ;;  %s244_s15 = sshll.u32 %s2854_s14, 4  ;;  %s245_s15 = int_to_ptr.vmem [resolvable:$true] %s244_s15 }
  0x12   : > { %s2855_s17 = smov [#allocation8]   ;;  %s2856_s19 = smov [#allocation9]  }
  0x13   : > { %s3474_s13 = scalar_select %p2972_p8, 1, 0 }
  0x14   : > { %p2527_p9 = pneg %p2972_p8  ;;  %s260_s18 = sshll.u32 %s2855_s17, 4  ;;  %s261_s18 = int_to_ptr.vmem [resolvable:$true] %s260_s18 }
  0x15   : > { %s274_s20 = sshll.u32 %s2856_s19, 4  ;;  %s2685_s21 = scalar_lea.vmem %s245_s15, 256  ;;  %s275_s20 = int_to_ptr.vmem [resolvable:$true] %s274_s20 }
  0x16   : > { %p2981_p11 = pnand %p2527_p9, %p3468_p1  ;;  %p2686_p13 = scmp.ne.s32.totalorder %s245_s15, %s2685_s21 }
  0x17   : > { %p2693_p5 = scmp.lt.s32.totalorder %s245_s15, %s245_s15  ;;  %p2694_p7 = scmp.lt.s32.totalorder %s2685_s21, %s2685_s21 }
  0x18   : > { %p2676_p12 = pneg %p2981_p11 }
  0x19   : > { %p2695_p9 = por %p2694_p7, %p2693_p5 }
  0x1a   : > { %p2688_p0 = pnand %p2686_p13, %p2676_p12 }
  0x1c   : > { %p2689_p3 = pneg %p2688_p0 }
  0x1e   : > { %p2696_p10 = pnand %p2695_p9, %p2689_p3 }
  0x20   : > { %2699 = shalt.err (!%p2696_p10)
}
  0x21   : > { %s2857_s22 = smov 64   ;;  %s2858_s23 = smov 4  }
  0x22   : > { %2530 = dma.hbm_to_vmem [thread:$0]  (!%p2981_p11), %s3460_s1, 256, %s245_s15, [#allocation7], %s2857_s22, %s2857_s22, %s2858_s23  }
  0x23   : > { %s2711_s26 = scalar_lea.vmem %s261_s18, 256  ;;  %p2719_p2 = scmp.lt.s32.totalorder %s261_s18, %s261_s18 }
  0x24   : > { %p2712_p1 = scmp.ne.s32.totalorder %s261_s18, %s2711_s26  ;;  %p2720_p6 = scmp.lt.s32.totalorder %s2711_s26, %s2711_s26 }
  0x26   : > { %p2714_p13 = pnand %p2712_p1, %p2676_p12  ;;  %p2721_p5 = por %p2720_p6, %p2719_p2 }
  0x28   : > { %p2715_p0 = pneg %p2714_p13 }
  0x2a   : > { %p2722_p3 = pnand %p2721_p5, %p2715_p0 }
  0x2c   : > { %2725 = shalt.err (!%p2722_p3)
}
  0x2d   : > { %2533 = dma.hbm_to_vmem [thread:$0]  (!%p2981_p11), %s3462_s3, 256, %s261_s18, [#allocation7], %s2857_s22, %s2857_s22, %s2858_s23  }
  0x2e   : > { %s2737_s10 = scalar_lea.vmem %s275_s20, 16  ;;  %s2744_s14 = scalar_lea.vmem %s275_s20, 32 }
  0x2f   : > { %p2738_p10 = scmp.ne.s32.totalorder %s275_s20, %s2737_s10  ;;  %p2745_p9 = scmp.lt.s32.totalorder %s275_s20, %s275_s20 }
  0x30   : > { %p2746_p13 = scmp.lt.s32.totalorder %s2744_s14, %s2737_s10 }
  0x31   : > { %p2740_p7 = pnand %p2738_p10, %p2676_p12 }
  0x32   : > { %p2747_p2 = por %p2746_p13, %p2745_p9 }
  0x33   : > { %p2741_p1 = pneg %p2740_p7 }
  0x35   : > { %p2748_p6 = pnand %p2747_p2, %p2741_p1 }
  0x37   : > { %2751 = shalt.err (!%p2748_p6)
}
  0x38   : > { %2536 = dma.hbm_to_vmem [thread:$0]  (!%p2981_p11), %s3463_s4, 16, %s275_s20, [#allocation10]  }
  0x39   : > { %s3012_s18 = sadd.s32 1, %s2852_s9   ;;  %s35_s16 = sadd.s32 1, %s2848_s30 }
  0x3a   : > { %s32_s19 = ssub.s32 %s2852_s9, %s3012_s18  ;;  %p42_p0 = scmp.ne.s32.totalorder %s2848_s30, %s2844_s29 }
  0x3b   : > { %p33_p12 = scmp.eq.s32.totalorder %s32_s19, 0  ;;  %p43_p5 = scmp.eq.s32.totalorder %s2852_s9, 0 }
  0x3c   : > { %p2548_p3 = scmp.lt.s32.totalorder %s2852_s9, 2  ;;  %p3476_p7 = scmp.eq.s32.totalorder %s2953_s7, 1 }
  0x3d   : > { %s3022_s21 = scalar_select %p33_p12, %s2848_s30, %s35_s16  }
  0x3e   : > { %p44_p10 = por %p43_p5, %p42_p0  ;;  %p3026_p1 = por %p3476_p7, %p42_p0 }
  0x3f   : > { %s294_s23 = sand.u32 1, %s2848_s30   ;;  %s2423_s24 = sshll.u32 %s2852_s9, 8 }
  0x40   : > { %s3477_s22 = scalar_select %p3026_p1, 1, 0 }
  0x41   : > { %s2367_s20 = sshll.u32 %s294_s23, 4  ;;  %s3035_s27 = scalar_lea.hbm %s3459_s0, %s2423_s24 }
  0x42   : > { %s298_s28 = scalar_lea.vmem [#allocation3], %s2367_s20  ;;  %p3037_p11 = pnand %p2548_p3, %p44_p10 }
  0x43   : > { %s305_s10 = sshll.u32 %s298_s28, 4  ;;  %s3043_s15 = scalar_lea.sflag [#allocation4], %s294_s23  ;;  %s3041_s10 = int_to_ptr.vmem [resolvable:$true] %s305_s10 }
  0x44   : > { %s2752_s17 = scalar_lea.hbm %s3035_s27, 256  ;;  %p2754_p13 = pneg %p3037_p11 }
  0x45   : > { %p2753_p9 = scmp.ne.s32.totalorder %s3035_s27, %s2752_s17  ;;  %s2757_s24 = scalar_lea.hbm %s3459_s0, 512 }
  0x46   : > { %p2758_p12 = scmp.lt.s32.totalorder %s3035_s27, %s3459_s0  ;;  %p2759_p0 = scmp.lt.s32.totalorder %s2757_s24, %s2752_s17 }
  0x47   : > { %p2755_p2 = pnand %p2754_p13, %p2753_p9 }
  0x48   : > { %p2760_p5 = por %p2759_p0, %p2758_p12 }
  0x49   : > { %p2756_p6 = pneg %p2755_p2 }
  0x4b   : > { %p2761_p3 = pnand %p2760_p5, %p2756_p6 }
  0x4d   : > { %2764 = shalt.err (!%p2761_p3)
}
  0x4e   : > { %s2765_s23 = scalar_lea.vmem %s3041_s10, 256  ;;  %s2859_s26 = smov [#allocation3]  }
  0x4f   : > { %p2766_p10 = scmp.ne.s32.totalorder %s3041_s10, %s2765_s23  ;;  %s2770_s28 = sshll.u32 %s2859_s26, 4  ;;  %s2771_s28 = int_to_ptr.vmem [resolvable:$false] %s2770_s28 }
  0x50   : > { %s2772_s19 = scalar_lea.vmem %s2771_s28, 512  ;;  %p2773_p2 = scmp.lt.s32.totalorder %s3041_s10, %s2771_s28 }
  0x51   : > { %p2768_p7 = pnand %p2766_p10, %p2754_p13  ;;  %p2774_p1 = scmp.lt.s32.totalorder %s2772_s19, %s2765_s23 }
  0x53   : > { %p2769_p9 = pneg %p2768_p7  ;;  %p2775_p4 = por %p2774_p1, %p2773_p2 }
  0x55   : > { %p2776_p8 = pnand %p2775_p4, %p2769_p9 }
  0x57   : > { %2779 = shalt.err (!%p2776_p8)
}
  0x58   : > { %s2860_s17 = smov 128   ;;  %s2861_s16 = smov 8  }
  0x59   : > { %2540 = dma.hbm_to_vmem [thread:$0]  (!%p3037_p11), %s3035_s27, 256, %s3041_s10, %s3043_s15, %s2860_s17, %s2860_s17, %s2861_s16  }
  0x5a   : > { %p3479_p13 = scmp.ne.s32.totalorder %s3474_s13, 0 }
  0x5b   : > { %s3067_s24 = sand.u32 (!%p3479_p13), 1, %s2844_s29   ;;  %p3480_p4 = scmp.ne.s32.totalorder (!%p3479_p13), %s3472_s11, 0 }
  0x5c   : > { %317 = sbr.rel (%p3479_p13) target bundleno = 1444 (0x5a4), region = 52  ;;  %s2371_s20 = sshll.u32 (!%p3479_p13), %s3067_s24, 4 }
  0x5d   : > { %s320_s25 = scalar_lea.sflag (!%p3479_p13), [#allocation4], %s3067_s24  ;;  %s323_s23 = scalar_lea.vmem (!%p3479_p13), [#allocation3], %s2371_s20 }
  0x61   : > { %2823 = dma.done.wait (%p3480_p4), %s320_s25, 256  }
  0x62   : > { %2825 = vsyncadd (%p3480_p4), %s320_s25, 4294967040  ;;  %p3481_p8 = scmp.eq.s32.totalorder %s2953_s7, 0 }
  0x64   : > { %2827 = dma.done.wait (%p3481_p8), [#allocation7], 512   ;;  %p3482_p1 = pmov %p3481_p8 }
  0x66   : > { %2829 = vsyncadd (%p3482_p1), [#allocation7], 4294966784  ;;  %p3483_p11 = pmov %p3482_p1 }
  0x67   : > { %p3484_p6 = pmov %p3482_p1 }
  0x68   : > { %2831 = dma.done.wait (%p3483_p11), [#allocation10], 16  }
  0x69   : > { %2833 = vsyncadd (%p3484_p6), [#allocation10], 4294967280  ;;  %v2862_v1 = vmov 0.0   ;;  %vm2863_vm0 = vmmov 0   ;;  %v2630_v2 = vld [vmem:[#allocation6 + $0x8] sm:$0xff]   ;;  %v2631_v3 = vld [vmem:[#allocation6] sm:$0xff]   ;;  %v513_v20 = vlaneseq }
  0x6a   : > { %2447 = vmatprep.subr.bf16.mxu0 %v2862_v1  ;;  %2451 = vmatprep.mubr.msk.bf16.mxu0 %vm2863_vm0, %v2862_v1  ;;  %v369_v4 = vld [vmem:[%s323_s23] sm:$0xff]  ;;  %v370_v5 = vld [vmem:[%s323_s23 + $0x8] sm:$0xff]  ;;  %vm395_vm1 = vcmask 261120   ;;  %s2864_s27 = smov 88   ;;  %s2865_s10 = smov 96   ;;  %vm1392_vm2 = vcmask 64512  }
  0x6b   : > { %2455 = vmatprep.subr.bf16.mxu1 %v2862_v1  ;;  %2457 = vmatprep.mubr.msk.bf16.mxu1 %vm2863_vm0, %v2862_v1  ;;  %v371_v6 = vpack.c.bf16 %v370_v5, %v369_v4  ;;  %v2376_v7 = vld [vmem:[%s3461_s2] ss:$0 sm:$0xff]  ;;  %s2866_s14 = smov 80   ;;  %s2867_s15 = smov 72   ;;  %v2875_v18 = vmov 1983009808  }
  0x6c   : > { %2448 = vmatpush3.bf16.msra.mxu0 %v2630_v2  ;;  %s2868_s26 = smov 120   ;;  %s2869_s28 = smov 112   ;;  %v511_v19 = vunpack.c.l.s4 %v2875_v18  ;;  %v3125_v24 = vshrl.u32 %v513_v20, 7  ;;  %v2876_v25 = vmov 1934713408   ;;  %vm1581_vm3 = vcmask 130048  }
  0x6d   : > { %2449 = vmatprep.subr.bf16.mxu0 %v2862_v1  ;;  %s2870_s19 = smov 104   ;;  %s2871_s17 = smov 64   ;;  %v575_v26 = vunpack.c.l.s4 %v2876_v25  ;;  %vm2154_vm4 = vcmask 195584  }
  0x6e   : > { %s2872_s16 = smov 48   ;;  %s2873_s25 = smov 56   ;;  %v512_v23 = vunpack.c.0.s8 %v511_v19 }
  0x6f   : > { %s2874_s23 = smov 40   ;;  %v576_v34 = vunpack.c.0.s8 %v575_v26  ;;  %p3485_p0 = scmp.ne.s32.totalorder %s3477_s22, 0 }
  0x70   : > { %2450 = vmatpush3.bf16.msra.mxu0 %v2631_v3  ;;  %v3128_v31 = vsub.s32 %v512_v23, %v3125_v24 }
  0x71   : > { %2461 = vmatprep.subr.bf16.mxu0 %v2862_v1  ;;  %v3135_v41 = vsub.s32 %v576_v34, %v3125_v24 }
  0x73   : > { %2452 = vmatmul.mubr.msk.bf16.vlgmr.msra.gmra.mxu0 %vm395_vm1, %v371_v6 }
  0x74   : > { %2463 = vmatprep.mubr.msk.bf16.mxu0 %vm2863_vm0, %v2862_v1 }
 0x133   : > { %v433_v8 = vpop.f32.mrf.mxu0 }
 0x134   : > { %v3099_v9 = vadd.f32 %v2376_v7, %v433_v8 }
 0x135   : > { %v2453_v10 = vpop.f32.mrf.mxu0 }
 0x136   : > { %466 = vrot.lane.b32.xlu1 %v3099_v9, %s2864_s27  ;;  %460 = vrot.lane.b32.xlu0 %v3099_v9, %s2865_s10 }
 0x137   : > { %v436_v11 = vpop.f32.mrf.mxu0 }
 0x138   : > { %v3103_v12 = vadd.f32 %v2376_v7, %v436_v11 }
 0x139   : > { %v2454_v13 = vpop.f32.mrf.mxu0 }
 0x13a   : > { %472 = vrot.lane.b32.xlu0 %v3099_v9, %s2866_s14  ;;  %468 = vrot.lane.b32.xlu1 %v3103_v12, %s2864_s27  ;;  %s2879_s27 = smov 16  }
 0x13e   : > { %478 = vrot.lane.b32.xlu0 %v3099_v9, %s2867_s15  ;;  %474 = vrot.lane.b32.xlu1 %v3103_v12, %s2866_s14  ;;  %s2881_s14 = smov 24  }
 0x142   : > { %442 = vrot.lane.b32.xlu0 %v3099_v9, %s2868_s26  ;;  %480 = vrot.lane.b32.xlu1 %v3103_v12, %s2867_s15  ;;  %s367_s15 = scalar_lea.vmem [#allocation11], %s2371_s20  ;;  %s2246_s20 = scalar_lea.sflag [#allocation5], %s3067_s24 }
 0x146   : > { %444 = vrot.lane.b32.xlu1 %v3103_v12, %s2868_s26  ;;  %462 = vrot.lane.b32.xlu0 %v3103_v12, %s2865_s10  ;;  %s2880_s10 = smov 8   ;;  %s2259_s26 = sshll.u32 %s367_s15, 4  ;;  %s3409_s26 = int_to_ptr.vmem [resolvable:$true] %s2259_s26 }
 0x14a   : > { %450 = vrot.lane.b32.xlu1 %v3103_v12, %s2869_s28  ;;  %448 = vrot.lane.b32.xlu0 %v3099_v9, %s2869_s28  ;;  %s2424_s28 = sshll.u32 %s2953_s7, 8  ;;  %s2882_s7 = smov [#allocation11]  }
 0x14e   : > { %456 = vrot.lane.b32.xlu1 %v3103_v12, %s2870_s19  ;;  %454 = vrot.lane.b32.xlu0 %v3099_v9, %s2870_s19 }
 0x152   : > { %484 = vrot.lane.b32.xlu1 %v3099_v9, %s2871_s17  ;;  %496 = vrot.lane.b32.xlu0 %v3099_v9, %s2872_s16 }
 0x156   : > { %490 = vrot.lane.b32.xlu1 %v3099_v9, %s2873_s25  ;;  %502 = vrot.lane.b32.xlu0 %v3099_v9, %s2874_s23 }
 0x15a   : > { %492 = vrot.lane.b32.xlu1 %v3103_v12, %s2873_s25  ;;  %486 = vrot.lane.b32.xlu0 %v3103_v12, %s2871_s17  ;;  %s2780_s25 = scalar_lea.vmem %s3409_s26, 256 }
 0x15b   : > { %p2781_p12 = scmp.ne.s32.totalorder %s3409_s26, %s2780_s25 }
 0x15d   : > { %p2782_p5 = pnand %p2781_p12, %p3485_p0 }
 0x15e   : > { %498 = vrot.lane.b32.xlu1 %v3103_v12, %s2872_s16  ;;  %s3414_s16 = scalar_lea.hbm %s3467_s8, %s2424_s28 }
 0x15f   : > { %p2783_p3 = pneg %p2782_p5 }
 0x1a8   : > { %v467_v14 = vpop.permute.xlu1 %466  ;;  %v461_v15 = vpop.permute.xlu0 %460 }
 0x1ac   : > { %v473_v16 = vpop.permute.xlu0 %472  ;;  %v469_v17 = vpop.permute.xlu1 %468 }
 0x1ad   : > { %v540_v32 = vcombine.low %v461_v15, %v473_v16  ;;  %v541_v33 = vcombine.high %v461_v15, %v473_v16 }
 0x1af   : > { %v548_v39 = vrot.slane %v540_v32, %v3128_v31  ;;  %v555_v40 = vrot.slane %v541_v33, %v3128_v31 }
 0x1b0   : > { %v479_v21 = vpop.permute.xlu0 %478  ;;  %v475_v22 = vpop.permute.xlu1 %474 }
 0x1b1   : > { %v556_v27 = vcombine.low %v467_v14, %v479_v21  ;;  %v557_v28 = vcombine.high %v467_v14, %v479_v21 }
 0x1b3   : > { %v564_v35 = vrot.slane %v556_v27, %v3128_v31  ;;  %v571_v36 = vrot.slane %v557_v28, %v3128_v31 }
 0x1b4   : > { %v443_v29 = vpop.permute.xlu0 %442  ;;  %v481_v30 = vpop.permute.xlu1 %480 }
 0x1b5   : > { %v604_v42 = vcombine.low %v548_v39, %v564_v35  ;;  %v605_v43 = vcombine.high %v548_v39, %v564_v35  ;;  %v620_v45 = vcombine.low %v555_v40, %v571_v36  ;;  %v621_v46 = vcombine.high %v555_v40, %v571_v36 }
 0x1b6   : > { %v760_v49 = vcombine.low %v469_v17, %v481_v30  ;;  %v761_v51 = vcombine.high %v469_v17, %v481_v30 }
 0x1b7   : > { %v612_v52 = vrot.slane %v604_v42, %v3135_v41  ;;  %v619_v53 = vrot.slane %v605_v43, %v3135_v41  ;;  %v628_v55 = vrot.slane %v620_v45, %v3135_v41  ;;  %v635_v56 = vrot.slane %v621_v46, %v3135_v41 }
 0x1b8   : > { %v445_v37 = vpop.permute.xlu1 %444  ;;  %v463_v38 = vpop.permute.xlu0 %462  ;;  %v768_v59 = vrot.slane %v760_v49, %v3128_v31  ;;  %v775_v63 = vrot.slane %v761_v51, %v3128_v31 }
 0x1b9   : > { %v744_v44 = vcombine.low %v463_v38, %v475_v22  ;;  %v745_v50 = vcombine.high %v463_v38, %v475_v22  ;;  %v2381_v3 = vcombine.low %v612_v52, %v619_v53  ;;  %v2383_v7 = vcombine.high %v612_v52, %v619_v53 }
 0x1ba   : > { %v2385_v13 = vcombine.low %v628_v55, %v635_v56  ;;  %v2387_v17 = vcombine.high %v628_v55, %v635_v56 }
 0x1bb   : > { %v752_v54 = vrot.slane %v744_v44, %v3128_v31  ;;  %v759_v60 = vrot.slane %v745_v50, %v3128_v31  ;;  %v3157_v23 = vrot.slane %v2381_v3, %v3128_v31 }
 0x1bc   : > { %v451_v47 = vpop.permute.xlu1 %450  ;;  %v449_v48 = vpop.permute.xlu0 %448  ;;  %v3168_v40 = vrot.slane %v2385_v13, %v3128_v31  ;;  %v3171_v42 = vrot.slane %v2387_v17, %v3128_v31 }
 0x1bd   : > { %v508_v0 = vcombine.low %v3099_v9, %v449_v48  ;;  %v808_v4 = vcombine.low %v752_v54, %v768_v59  ;;  %v809_v5 = vcombine.high %v752_v54, %v768_v59  ;;  %v509_v6 = vcombine.high %v3099_v9, %v449_v48 }
 0x1be   : > { %v712_v8 = vcombine.low %v3103_v12, %v451_v47  ;;  %v824_v14 = vcombine.low %v759_v60, %v775_v63  ;;  %v825_v15 = vcombine.high %v759_v60, %v775_v63  ;;  %v713_v18 = vcombine.high %v3103_v12, %v451_v47 }
 0x1bf   : > { %v516_v19 = vrot.slane %v508_v0, %v3128_v31  ;;  %v816_v9 = vrot.slane %v808_v4, %v3135_v41  ;;  %v823_v21 = vrot.slane %v809_v5, %v3135_v41  ;;  %v523_v22 = vrot.slane %v509_v6, %v3128_v31 }
 0x1c0   : > { %v457_v57 = vpop.permute.xlu1 %456  ;;  %v455_v58 = vpop.permute.xlu0 %454  ;;  %v720_v25 = vrot.slane %v712_v8, %v3128_v31  ;;  %v839_v30 = vrot.slane %v825_v15, %v3135_v41  ;;  %v727_v34 = vrot.slane %v713_v18, %v3128_v31  ;;  %v1028_v54 = vcombine.low %v3168_v40, %v3171_v42 }
 0x1c1   : > { %v524_v61 = vcombine.low %v443_v29, %v455_v58  ;;  %v525_v62 = vcombine.high %v443_v29, %v455_v58  ;;  %v728_v2 = vcombine.low %v445_v37, %v457_v57  ;;  %v729_v10 = vcombine.high %v445_v37, %v457_v57 }
 0x1c2   : > { %v832_v29 = vrot.slane %v824_v14, %v3135_v41  ;;  %v3165_v37 = vrot.slane %v2383_v7, %v3128_v31  ;;  %v2389_v38 = vcombine.low %v816_v9, %v823_v21  ;;  %v2391_v39 = vcombine.high %v816_v9, %v823_v21 }
 0x1c3   : > { %v532_v11 = vrot.slane %v524_v61, %v3128_v31  ;;  %v539_v16 = vrot.slane %v525_v62, %v3128_v31  ;;  %v736_v20 = vrot.slane %v728_v2, %v3128_v31  ;;  %v743_v26 = vrot.slane %v729_v10, %v3128_v31 }
 0x1c4   : > { %v2393_v47 = vcombine.low %v832_v29, %v839_v30  ;;  %v2395_v48 = vcombine.high %v832_v29, %v839_v30  ;;  %v996_v53 = vcombine.low %v3157_v23, %v3165_v37  ;;  %v3184_v55 = vrot.slane %v2389_v38, %v3128_v31 }
 0x1c5   : > { %v572_v27 = vcombine.low %v516_v19, %v532_v11  ;;  %v573_v28 = vcombine.high %v516_v19, %v532_v11  ;;  %v588_v32 = vcombine.low %v523_v22, %v539_v16  ;;  %v589_v33 = vcombine.high %v523_v22, %v539_v16 }
 0x1c6   : > { %v776_v35 = vcombine.low %v720_v25, %v736_v20  ;;  %v777_v36 = vcombine.high %v720_v25, %v736_v20  ;;  %v792_v43 = vcombine.low %v727_v34, %v743_v26  ;;  %v793_v44 = vcombine.high %v727_v34, %v743_v26 }
 0x1c7   : > { %v580_v45 = vrot.slane %v572_v27, %v3135_v41  ;;  %v587_v46 = vrot.slane %v573_v28, %v3135_v41  ;;  %v596_v49 = vrot.slane %v588_v32, %v3135_v41  ;;  %v603_v50 = vrot.slane %v589_v33, %v3135_v41 }
 0x1c8   : > { %v784_v51 = vrot.slane %v776_v35, %v3135_v41  ;;  %v791_v52 = vrot.slane %v777_v36, %v3135_v41  ;;  %v1083_v56 = vrot.slane %v2391_v39, %v3128_v31  ;;  %v800_v57 = vrot.slane %v792_v43, %v3135_v41 }
 0x1c9   : > { %v807_v58 = vrot.slane %v793_v44, %v3135_v41  ;;  %v2380_v59 = vcombine.low %v580_v45, %v587_v46  ;;  %v2382_v60 = vcombine.high %v580_v45, %v587_v46  ;;  %v2384_v61 = vcombine.low %v596_v49, %v603_v50 }
 0x1ca   : > { %v2386_v62 = vcombine.high %v596_v49, %v603_v50  ;;  %v1099_v63 = vrot.slane %v2393_v47, %v3128_v31  ;;  %v1115_v0 = vrot.slane %v2395_v48, %v3128_v31  ;;  %v2388_v2 = vcombine.low %v784_v51, %v791_v52 }
 0x1cb   : > { %v2390_v3 = vcombine.high %v784_v51, %v791_v52  ;;  %v1004_v4 = vrot.slane %v996_v53, %v3135_v41  ;;  %v1036_v5 = vrot.slane %v1028_v54, %v3135_v41  ;;  %v1132_v6 = vcombine.low %v3184_v55, %v1083_v56 }
 0x1cc   : > { %v1164_v7 = vcombine.low %v1099_v63, %v1115_v0  ;;  %v2392_v8 = vcombine.low %v800_v57, %v807_v58  ;;  %v2394_v10 = vcombine.high %v800_v57, %v807_v58  ;;  %v924_v11 = vrot.slane %v2380_v59, %v3128_v31 }
 0x1cd   : > { %v940_v13 = vrot.slane %v2382_v60, %v3128_v31  ;;  %v956_v14 = vrot.slane %v2384_v61, %v3128_v31  ;;  %v972_v15 = vrot.slane %v2386_v62, %v3128_v31  ;;  %v1140_v16 = vrot.slane %v1132_v6, %v3135_v41 }
 0x1ce   : > { %v1172_v17 = vrot.slane %v1164_v7, %v3135_v41  ;;  %v1048_v18 = vcombine.low %v1004_v4, %v1036_v5  ;;  %v1049_v20 = vcombine.high %v1004_v4, %v1036_v5  ;;  %v1060_v21 = vrot.slane %v2388_v2, %v3128_v31 }
 0x1cf   : > { %v1076_v22 = vrot.slane %v2390_v3, %v3128_v31  ;;  %v1092_v25 = vrot.slane %v2392_v8, %v3128_v31  ;;  %v1108_v26 = vrot.slane %v2394_v10, %v3128_v31  ;;  %v980_v29 = vcombine.low %v924_v11, %v940_v13 }
 0x1d0   : > { %v1184_v19 = vcombine.low %v1140_v16, %v1172_v17  ;;  %v1185_v9 = vcombine.high %v1140_v16, %v1172_v17  ;;  %v1012_v30 = vcombine.low %v956_v14, %v972_v15  ;;  %v997_v39 = vcombine.high %v3157_v23, %v3165_v37 }
 0x1d1   : > { %v988_v34 = vrot.slane %v980_v29, %v3135_v41  ;;  %v1116_v36 = vcombine.low %v1060_v21, %v1076_v22  ;;  %v1148_v38 = vcombine.low %v1092_v25, %v1108_v26  ;;  %v1117_v43 = vcombine.high %v1060_v21, %v1076_v22 }
 0x1d2   : > { %v1388_v27 = vpack.c.bf16 %v1184_v19, %v1048_v18  ;;  %v1389_v28 = vpack.c.bf16 %v1185_v9, %v1049_v20  ;;  %v1020_v35 = vrot.slane %v1012_v30, %v3135_v41  ;;  %v1029_v45 = vcombine.high %v3168_v40, %v3171_v42 }
 0x1d3   : > { %v1124_v47 = vrot.slane %v1116_v36, %v3135_v41  ;;  %v1156_v48 = vrot.slane %v1148_v38, %v3135_v41  ;;  %v1133_v49 = vcombine.high %v3184_v55, %v1083_v56  ;;  %v981_v50 = vcombine.high %v924_v11, %v940_v13 }
 0x1d4   : > { %v1397_v32 = vsel %vm1392_vm2, %v1388_v27, 0  ;;  %v1444_v33 = vsel %vm1392_vm2, %v1389_v28, 0  ;;  %v1044_v44 = vcombine.low %v988_v34, %v1020_v35  ;;  %v1045_v46 = vcombine.high %v988_v34, %v1020_v35 }
 0x1d5   : > { %2456 = vmatpush3.bf16.xpose.msra.mxu1 %v1397_v32  ;;  %2462 = vmatpush3.bf16.xpose.msra.mxu0 %v1444_v33  ;;  %v1011_v51 = vrot.slane %v997_v39, %v3135_v41  ;;  %v1043_v23 = vrot.slane %v1029_v45, %v3135_v41  ;;  %v1165_v37 = vcombine.high %v1099_v63, %v1115_v0  ;;  %v1324_v45 = vld [vmem:[%s3465_s6] sm:$0xf] }
 0x1d6   : > { %2467 = vmatprep.subr.bf16.mxu1 %v2862_v1  ;;  %2473 = vmatprep.subr.bf16.mxu0 %v2862_v1  ;;  %v1013_v52 = vcombine.high %v956_v14, %v972_v15  ;;  %v1180_v53 = vcombine.low %v1124_v47, %v1156_v48  ;;  %v1181_v54 = vcombine.high %v1124_v47, %v1156_v48  ;;  %v485_v48 = vpop.permute.xlu1 %484 }
 0x1d7   : > { %v1147_v57 = vrot.slane %v1133_v49, %v3135_v41  ;;  %v1149_v58 = vcombine.high %v1092_v25, %v1108_v26  ;;  %v1179_v40 = vrot.slane %v1165_v37, %v3135_v41  ;;  %v1050_v60 = vcombine.low %v1011_v51, %v1043_v23  ;;  %v497_v49 = vpop.permute.xlu0 %496 }
 0x1d8   : > { %v1384_v42 = vpack.c.bf16 %v1180_v53, %v1044_v44  ;;  %v1385_v59 = vpack.c.bf16 %v1181_v54, %v1045_v46  ;;  %v1051_v62 = vcombine.high %v1011_v51, %v1043_v23  ;;  %v1131_v56 = vrot.slane %v1117_v43, %v3135_v41 }
 0x1d9   : > { %v1186_v61 = vcombine.low %v1147_v57, %v1179_v40  ;;  %v1187_v55 = vcombine.high %v1147_v57, %v1179_v40  ;;  %v995_v2 = vrot.slane %v981_v50, %v3135_v41  ;;  %v1027_v63 = vrot.slane %v1013_v52, %v3135_v41 }
 0x1da   : > { %v1163_v0 = vrot.slane %v1149_v58, %v3135_v41  ;;  %v2400_v46 = vmul.f32 -1.442695, %v1324_v45  ;;  %v491_v51 = vpop.permute.xlu1 %490  ;;  %v2877_v52 = vmov 1966171168   ;;  %v644_v53 = vcombine.low %v485_v48, %v497_v49 }
 0x1db   : > { %v1390_v3 = vpack.c.bf16 %v1186_v61, %v1050_v60  ;;  %v1391_v4 = vpack.c.bf16 %v1187_v55, %v1051_v62  ;;  %v1046_v7 = vcombine.low %v995_v2, %v1027_v63  ;;  %v1047_v10 = vcombine.high %v995_v2, %v1027_v63  ;;  %v503_v23 = vpop.permute.xlu0 %502 }
 0x1dc   : > { %2458 = vmatmul.mubr.msk.bf16.vlgmr.msra.gmra.mxu1 %vm1392_vm2, %v1384_v42  ;;  %2464 = vmatmul.mubr.msk.bf16.vlgmr.msra.gmra.mxu0 %vm1392_vm2, %v1385_v59  ;;  %v1182_v8 = vcombine.low %v1131_v56, %v1163_v0  ;;  %v1183_v11 = vcombine.high %v1131_v56, %v1163_v0  ;;  %2634 = vpow2.f32 %v2400_v46  ;;  %v660_v37 = vcombine.low %v491_v51, %v503_v23 }
 0x1dd   : > { %2469 = vmatprep.mubr.msk.bf16.mxu1 %vm2863_vm0, %v2862_v1  ;;  %2475 = vmatprep.mubr.msk.bf16.mxu0 %vm2863_vm0, %v2862_v1  ;;  %v1491_v5 = vsel %vm1392_vm2, %v1390_v3, 0  ;;  %v1538_v6 = vsel %vm1392_vm2, %v1391_v4, 0  ;;  %v661_v54 = vcombine.high %v491_v51, %v503_v23  ;;  %v645_v57 = vcombine.high %v485_v48, %v497_v49 }
 0x1de   : > { %2468 = vmatpush3.bf16.xpose.msra.mxu1 %v1491_v5  ;;  %2474 = vmatpush3.bf16.xpose.msra.mxu0 %v1538_v6  ;;  %v1386_v13 = vpack.c.bf16 %v1182_v8, %v1046_v7  ;;  %v1387_v14 = vpack.c.bf16 %v1183_v11, %v1047_v10  ;;  %v668_v58 = vrot.slane %v660_v37, %v3128_v31  ;;  %v493_v60 = vpop.permute.xlu1 %492  ;;  %v3295_v46 = vsub.s32 0, %v3125_v24 }
 0x1df   : > { %2479 = vmatprep.subr.bf16.mxu1 %v2862_v1  ;;  %2485 = vmatprep.subr.bf16.mxu0 %v2862_v1  ;;  %v652_v42 = vrot.slane %v644_v53, %v3128_v31  ;;  %v675_v59 = vrot.slane %v661_v54, %v3128_v31  ;;  %v659_v61 = vrot.slane %v645_v57, %v3128_v31  ;;  %v487_v56 = vpop.permute.xlu0 %486 }
 0x1e1   : > { %v676_v62 = vcombine.low %v652_v42, %v668_v58  ;;  %v677_v55 = vcombine.high %v652_v42, %v668_v58  ;;  %v692_v0 = vcombine.low %v659_v61, %v675_v59  ;;  %v693_v3 = vcombine.high %v659_v61, %v675_v59 }
 0x1e2   : > { %v499_v6 = vpop.permute.xlu1 %498 }
 0x1e3   : > { %v684_v4 = vrot.slane %v676_v62, %v3135_v41  ;;  %v691_v5 = vrot.slane %v677_v55, %v3135_v41  ;;  %v700_v11 = vrot.slane %v692_v0, %v3135_v41 }
 0x1e5   : > { %2470 = vmatmul.mubr.msk.bf16.vlgmr.msra.gmra.mxu1 %vm1392_vm2, %v1386_v13  ;;  %2476 = vmatmul.mubr.msk.bf16.vlgmr.msra.gmra.mxu0 %vm1392_vm2, %v1387_v14  ;;  %v707_v13 = vrot.slane %v693_v3, %v3135_v41 }
 0x1e6   : > { %2481 = vmatprep.mubr.msk.bf16.mxu1 %vm2863_vm0, %v2862_v1  ;;  %2487 = vmatprep.mubr.msk.bf16.mxu0 %vm2863_vm0, %v2862_v1 }
 0x1e9   : > { %v2635_v47 = vpop.eup %2634 }
 0x1ea   : > { %v1328_v50 = vadd.f32 1.0, %v2635_v47 }
 0x1ec   : > { %2636 = vrcp.f32 %v1328_v50 }
 0x1f9   : > { %v2637_v63 = vpop.eup %2636 }
 0x29c   : > { %v3241_v15 = vpop.f32.mrf.mxu1  ;;  %v3243_v16 = vpop.f32.mrf.mxu0 }
 0x29d   : > { %v1582_v17 = vsel %vm1581_vm3, %v3241_v15, -inf  ;;  %v1588_v22 = vsel %vm1581_vm3, %v3243_v16, -inf }
 0x29e   : > { %1583 = vmax.xlane.f32.xlu0 %v1582_v17  ;;  %v2459_v18 = vpop.f32.mrf.mxu1  ;;  %v2465_v19 = vpop.f32.mrf.mxu0  ;;  %v1188_v17 = vcombine.low %v684_v4, %v691_v5 }
 0x29f   : > { %v848_v18 = vcombine.low %v487_v56, %v499_v6 }
 0x2a0   : > { %v3247_v20 = vpop.f32.mrf.mxu1  ;;  %v3249_v9 = vpop.f32.mrf.mxu0 }
 0x2a1   : > { %v1585_v21 = vsel %vm1581_vm3, %v3247_v20, -inf  ;;  %v1591_v27 = vsel %vm1581_vm3, %v3249_v9, -inf }
 0x2a2   : > { %1586 = vmax.xlane.f32.xlu1 %v1585_v21  ;;  %v2460_v25 = vpop.f32.mrf.mxu1  ;;  %1589 = vmax.xlane.f32.xlu0 %v1588_v22  ;;  %v2466_v26 = vpop.f32.mrf.mxu0 }
 0x2a5   : > { %v3257_v28 = vpop.f32.mrf.mxu1  ;;  %v3259_v29 = vpop.f32.mrf.mxu0 }
 0x2a6   : > { %1592 = vmax.xlane.f32.xlu0 %v1591_v27  ;;  %v1594_v33 = vsel %vm1581_vm3, %v3257_v28, -inf  ;;  %v1600_v39 = vsel %vm1581_vm3, %v3259_v29, -inf  ;;  %v2396_v27 = vcombine.high %v684_v4, %v691_v5 }
 0x2a7   : > { %v2471_v30 = vpop.f32.mrf.mxu1  ;;  %v2477_v32 = vpop.f32.mrf.mxu0 }
 0x2a8   : > { %v1204_v30 = vcombine.low %v700_v11, %v707_v13  ;;  %v2397_v32 = vcombine.high %v700_v11, %v707_v13  ;;  %v1203_v49 = vrot.slane %v2396_v27, %v3128_v31 }
 0x2a9   : > { %v3263_v34 = vpop.f32.mrf.mxu1  ;;  %v3265_v35 = vpop.f32.mrf.mxu0 }
 0x2aa   : > { %1595 = vmax.xlane.f32.xlu0 %v1594_v33  ;;  %v1603_v43 = vsel %vm1581_vm3, %v3265_v35, -inf  ;;  %v1597_v44 = vsel %vm1581_vm3, %v3263_v34, -inf  ;;  %v849_v33 = vcombine.high %v487_v56, %v499_v6  ;;  %v1211_v50 = vrot.slane %v1204_v30, %v3128_v31 }
 0x2ab   : > { %v2472_v36 = vpop.f32.mrf.mxu1  ;;  %v2478_v38 = vpop.f32.mrf.mxu0  ;;  %v1219_v51 = vrot.slane %v2397_v32, %v3128_v31 }
 0x2ac   : > { %v863_v23 = vrot.slane %v849_v33, %v3128_v31 }
 0x2ad   : > { %v1237_v0 = vcombine.high %v1211_v50, %v1219_v51 }
 0x2ae   : > { %1601 = vmax.xlane.f32.xlu0 %v1600_v39  ;;  %v1195_v39 = vrot.slane %v1188_v17, %v3128_v31 }
 0x2b0   : > { %v1220_v59 = vcombine.low %v1195_v39, %v1203_v49 }
 0x2b2   : > { %1604 = vmax.xlane.f32.xlu0 %v1603_v43  ;;  %v856_v43 = vrot.slane %v848_v18, %v3128_v31  ;;  %v1228_v13 = vrot.slane %v1220_v59, %v3135_v41 }
 0x2b3   : > { %504 = vrot.lane.b32.xlu1 %v3103_v12, %s2874_s23  ;;  %v1333_v12 = vunpack.c.l.s4 %v2877_v52  ;;  %s2784_s23 = sshll.u32 %s2882_s7, 4  ;;  %s2785_s23 = int_to_ptr.vmem [resolvable:$false] %s2784_s23 }
 0x2b4   : > { %s2786_s11 = scalar_lea.vmem %s2785_s23, 512  ;;  %p2787_p10 = scmp.lt.s32.totalorder %s3409_s26, %s2785_s23 }
 0x2b5   : > { %v1334_v40 = vunpack.c.0.s8 %v1333_v12  ;;  %p2788_p7 = scmp.lt.s32.totalorder %s2786_s11, %s2780_s25 }
 0x2b7   : > { %v1337_v2 = vsub.s32 %v1334_v40, %v3125_v24  ;;  %p2789_p9 = por %p2788_p7, %p2787_p10 }
 0x2b9   : > { %v1338_v8 = vrot.slane %v2637_v63, %v1337_v2  ;;  %v1221_v63 = vcombine.high %v1195_v39, %v1203_v49  ;;  %p2790_p2 = pnand %p2789_p9, %p2783_p3 }
 0x2bb   : > { %v1339_v22 = vcombine.high %v1338_v8, %v1338_v8  ;;  %v3290_v38 = vrot.slane %v1338_v8, %v1337_v2  ;;  %v1235_v27 = vrot.slane %v1221_v63, %v3135_v41 }
 0x2bd   : > { %v3308_v53 = vrot.slane %v3290_v38, %v3295_v46 }
 0x2d7   : > { %1598 = vmax.xlane.f32.xlu1 %v1597_v44 }
 0x327   : > { %v1584_v7 = vpop.xlane.xlu0 %1583 }
 0x328   : > { %v1606_v10 = vsub.f32 %v3241_v15, %v1584_v7 }
 0x32a   : > { %v1614_v14 = vmul.f32 1.442695, %v1606_v10 }
 0x32b   : > { %v1587_v19 = vpop.xlane.xlu1 %1586  ;;  %v1590_v21 = vpop.xlane.xlu0 %1589 }
 0x32c   : > { %2638 = vpow2.f32 %v1614_v14  ;;  %v1607_v25 = vsub.f32 %v3247_v20, %v1587_v19  ;;  %v1608_v26 = vsub.f32 %v3243_v16, %v1590_v21  ;;  %v3297_v20 = vrot.slane %v1339_v22, %v1337_v2 }
 0x32e   : > { %v1616_v15 = vmul.f32 1.442695, %v1607_v25  ;;  %v1618_v36 = vmul.f32 1.442695, %v1608_v26  ;;  %v1355_v54 = vcombine.high %v3297_v20, %v3297_v20  ;;  %v1363_v5 = vrot.slane %v3297_v20, %v3295_v46 }
 0x32f   : > { %v505_v44 = vpop.permute.xlu1 %504  ;;  %v1593_v45 = vpop.xlane.xlu0 %1592 }
 0x330   : > { %2640 = vpow2.f32 %v1616_v15  ;;  %v864_v16 = vcombine.low %v493_v60, %v505_v44  ;;  %v865_v47 = vcombine.high %v493_v60, %v505_v44  ;;  %v1609_v48 = vsub.f32 %v3249_v9, %v1593_v45 }
 0x331   : > { %2642 = vpow2.f32 %v1618_v36  ;;  %v1354_v9 = vcombine.high %v3290_v38, %v3290_v38  ;;  %v1236_v60 = vcombine.low %v1211_v50, %v1219_v51 }
 0x332   : > { %v872_v37 = vrot.slane %v864_v16, %v3128_v31  ;;  %v879_v24 = vrot.slane %v865_v47, %v3128_v31  ;;  %v1620_v52 = vmul.f32 1.442695, %v1609_v48 }
 0x333   : > { %v1596_v12 = vpop.xlane.xlu0 %1595  ;;  %v1244_v14 = vrot.slane %v1236_v60, %v3135_v41 }
 0x334   : > { %v880_v57 = vcombine.low %v856_v43, %v872_v37  ;;  %v881_v58 = vcombine.high %v856_v43, %v872_v37  ;;  %v896_v40 = vcombine.low %v863_v23, %v879_v24  ;;  %v897_v42 = vcombine.high %v863_v23, %v879_v24 }
 0x335   : > { %2644 = vpow2.f32 %v1620_v52  ;;  %v1610_v61 = vsub.f32 %v3257_v28, %v1596_v12  ;;  %v1252_v39 = vcombine.low %v1228_v13, %v1244_v14  ;;  %v1367_v43 = vrot.slane %v1354_v9, %v3295_v46 }
 0x336   : > { %v888_v62 = vrot.slane %v880_v57, %v3135_v41  ;;  %v895_v55 = vrot.slane %v881_v58, %v3135_v41  ;;  %v904_v56 = vrot.slane %v896_v40, %v3135_v41  ;;  %v911_v2 = vrot.slane %v897_v42, %v3135_v41 }
 0x337   : > { %v1622_v3 = vmul.f32 1.442695, %v1610_v61  ;;  %v1602_v4 = vpop.xlane.xlu0 %1601  ;;  %v1253_v47 = vcombine.high %v1228_v13, %v1244_v14  ;;  %v1371_v24 = vrot.slane %v1355_v54, %v3295_v46  ;;  %v1376_v58 = vmul.f32 %v3308_v53, %v1252_v39 }
 0x338   : > { %v1256_v6 = vcombine.low %v888_v62, %v895_v55  ;;  %v2398_v7 = vcombine.high %v888_v62, %v895_v55  ;;  %v1272_v8 = vcombine.low %v904_v56, %v911_v2  ;;  %v2399_v10 = vcombine.high %v904_v56, %v911_v2 }
 0x339   : > { %v3321_v28 = vpop.eup %2638  ;;  %2646 = vpow2.f32 %v1622_v3  ;;  %v1612_v11 = vsub.f32 %v3259_v29, %v1602_v4  ;;  %v1251_v29 = vrot.slane %v1237_v0, %v3135_v41  ;;  %v1378_v42 = vmul.f32 %v1363_v5, %v1253_v47 }
 0x33a   : > { %v1263_v17 = vrot.slane %v1256_v6, %v3128_v31  ;;  %v1271_v18 = vrot.slane %v2398_v7, %v3128_v31  ;;  %v1279_v19 = vrot.slane %v1272_v8, %v3128_v31  ;;  %v1287_v21 = vrot.slane %v2399_v10, %v3128_v31 }
 0x33b   : > { %v1626_v22 = vmul.f32 1.442695, %v1612_v11  ;;  %v1630_v25 = vsel %vm1581_vm3, %v3321_v28, 0.0  ;;  %v1605_v26 = vpop.xlane.xlu0 %1604  ;;  %v1254_v37 = vcombine.low %v1235_v27, %v1251_v29  ;;  %v1255_v12 = vcombine.high %v1235_v27, %v1251_v29 }
 0x33c   : > { %v1288_v30 = vcombine.low %v1263_v17, %v1271_v18  ;;  %v1289_v32 = vcombine.high %v1263_v17, %v1271_v18  ;;  %v1304_v33 = vcombine.low %v1279_v19, %v1287_v21  ;;  %v1305_v15 = vcombine.high %v1279_v19, %v1287_v21  ;;  %1631 = vadd.xlane.f32.xlu1 %v1630_v25 }
 0x33d   : > { %v2641_v36 = vpop.eup %2640  ;;  %2648 = vpow2.f32 %v1626_v22  ;;  %v1613_v38 = vsub.f32 %v3265_v35, %v1605_v26  ;;  %v1380_v54 = vmul.f32 %v1367_v43, %v1254_v37  ;;  %v1382_v63 = vmul.f32 %v1371_v24, %v1255_v12 }
 0x33e   : > { %v2643_v44 = vpop.eup %2642  ;;  %v1633_v45 = vsel %vm1581_vm3, %v2641_v36, 0.0  ;;  %v1296_v20 = vrot.slane %v1288_v30, %v3135_v41  ;;  %v1312_v16 = vrot.slane %v1304_v33, %v3135_v41  ;;  %v1303_v50 = vrot.slane %v1289_v32, %v3135_v41 }
 0x33f   : > { %v1628_v48 = vmul.f32 1.442695, %v1613_v38  ;;  %v1636_v49 = vsel %vm1581_vm3, %v2643_v44, 0.0  ;;  %1634 = vadd.xlane.f32.xlu0 %v1633_v45  ;;  %v1319_v51 = vrot.slane %v1305_v15, %v3135_v41  ;;  %v1654_v3 = vpack.c.bf16 %v2641_v36, %v3321_v28 }
 0x340   : > { %1637 = vadd.xlane.f32.xlu1 %v1636_v49  ;;  %v1320_v35 = vcombine.low %v1296_v20, %v1312_v16  ;;  %v1321_v23 = vcombine.high %v1296_v20, %v1312_v16 }
 0x341   : > { %2650 = vpow2.f32 %v1628_v48  ;;  %v1322_v52 = vcombine.low %v1303_v50, %v1319_v51  ;;  %v1323_v9 = vcombine.high %v1303_v50, %v1319_v51 }
 0x342   : > { %v2645_v57 = vpop.eup %2644  ;;  %v1377_v40 = vmul.f32 %v3308_v53, %v1320_v35  ;;  %v1379_v59 = vmul.f32 %v1363_v5, %v1321_v23 }
 0x343   : > { %v1639_v60 = vsel %vm1581_vm3, %v2645_v57, 0.0  ;;  %v1381_v55 = vmul.f32 %v1367_v43, %v1322_v52  ;;  %v1383_v56 = vmul.f32 %v1371_v24, %v1323_v9  ;;  %v1655_v4 = vpack.c.bf16 %v2645_v57, %v2643_v44 }
 0x344   : > { %1640 = vadd.xlane.f32.xlu0 %v1639_v60  ;;  %v1658_v61 = vpack.c.bf16 %v1377_v40, %v1376_v58  ;;  %v1659_v62 = vpack.c.bf16 %v1379_v59, %v1378_v42 }
 0x345   : > { %v1660_v53 = vpack.c.bf16 %v1381_v55, %v1380_v54  ;;  %v1661_v5 = vpack.c.bf16 %v1383_v56, %v1382_v63 }
 0x346   : > { %v2647_v2 = vpop.eup %2646  ;;  %2480 = vmatpush3.bf16.msra.mxu1 %v1658_v61  ;;  %2486 = vmatpush3.bf16.msra.mxu0 %v1659_v62 }
 0x347   : > { %v1642_v0 = vsel %vm1581_vm3, %v2647_v2, 0.0  ;;  %2491 = vmatprep.subr.bf16.mxu1 %v2862_v1  ;;  %2497 = vmatprep.subr.bf16.mxu0 %v2862_v1 }
 0x348   : > { %1643 = vadd.xlane.f32.xlu1 %v1642_v0 }
 0x349   : > { %2482 = vmatmul.mubr.msk.bf16.vlgmr.msra.gmra.mxu1 %vm1581_vm3, %v1654_v3  ;;  %2488 = vmatmul.mubr.msk.bf16.vlgmr.msra.gmra.mxu0 %vm1581_vm3, %v1655_v4 }
 0x34a   : > { %v2649_v6 = vpop.eup %2648  ;;  %2492 = vmatpush3.bf16.msra.mxu1 %v1660_v53  ;;  %2498 = vmatpush3.bf16.msra.mxu0 %v1661_v5 }
 0x34b   : > { %v1648_v7 = vsel %vm1581_vm3, %v2649_v6, 0.0  ;;  %2499 = vmatprep.mubr.msk.bf16.mxu0 %vm2863_vm0, %v2862_v1  ;;  %2493 = vmatprep.mubr.msk.bf16.mxu1 %vm2863_vm0, %v2862_v1 }
 0x34c   : > { %1649 = vadd.xlane.f32.xlu1 %v1648_v7  ;;  %2503 = vmatprep.subr.bf16.mxu1 %v2862_v1 }
 0x34e   : > { %v2651_v8 = vpop.eup %2650 }
 0x34f   : > { %v1657_v10 = vpack.c.bf16 %v2651_v8, %v2649_v6  ;;  %v1651_v19 = vsel %vm1581_vm3, %v2651_v8, 0.0 }
 0x351   : > { %2500 = vmatmul.mubr.msk.bf16.vlgmr.msra.gmra.mxu0 %vm1581_vm3, %v1657_v10 }
 0x360   : > { %v1599_v28 = vpop.xlane.xlu1 %1598 }
 0x361   : > { %v1611_v11 = vsub.f32 %v3263_v34, %v1599_v28 }
 0x363   : > { %v1624_v13 = vmul.f32 1.442695, %v1611_v11 }
 0x365   : > { %2652 = vpow2.f32 %v1624_v13 }
 0x372   : > { %v2653_v14 = vpop.eup %2652 }
 0x373   : > { %v1645_v17 = vsel %vm1581_vm3, %v2653_v14, 0.0  ;;  %v1656_v18 = vpack.c.bf16 %v2653_v14, %v2647_v2 }
 0x374   : > { %1646 = vadd.xlane.f32.xlu0 %v1645_v17 }
 0x375   : > { %2494 = vmatmul.mubr.msk.bf16.vlgmr.msra.gmra.mxu1 %vm1581_vm3, %v1656_v18 }
 0x376   : > { %2507 = vmatprep.mubr.msk.bf16.mxu1 %vm2863_vm0, %v2862_v1 }
 0x378   : > { %1652 = vadd.xlane.f32.xlu0 %v1651_v19 }
 0x3c5   : > { %v1632_v32 = vpop.xlane.xlu1 %1631 }
 0x3c8   : > { %v1635_v39 = vpop.xlane.xlu0 %1634 }
 0x3c9   : > { %v1638_v38 = vpop.xlane.xlu1 %1637 }
 0x3cd   : > { %v1641_v45 = vpop.xlane.xlu0 %1640 }
 0x3d1   : > { %v1644_v44 = vpop.xlane.xlu1 %1643 }
 0x3d5   : > { %v1650_v20 = vpop.xlane.xlu1 %1649 }
 0x3d6   : > { %2654 = vrcp.f32 %v1650_v20 }
 0x3d7   : > { %2656 = vrcp.f32 %v1638_v38 }
 0x3d8   : > { %2658 = vrcp.f32 %v1632_v32 }
 0x3d9   : > { %2660 = vrcp.f32 %v1644_v44 }
 0x3e3   : > { %v2655_v48 = vpop.eup %2654 }
 0x3e4   : > { %v2657_v50 = vpop.eup %2656 }
 0x3e5   : > { %v2659_v35 = vpop.eup %2658 }
 0x3e6   : > { %v2661_v23 = vpop.eup %2660 }
 0x3fd   : > { %v1647_v16 = vpop.xlane.xlu0 %1646 }
 0x401   : > { %v1653_v47 = vpop.xlane.xlu0 %1652 }
 0x402   : > { %2662 = vrcp.f32 %v1653_v47 }
 0x403   : > { %2664 = vrcp.f32 %v1641_v45 }
 0x404   : > { %2666 = vrcp.f32 %v1647_v16 }
 0x405   : > { %2668 = vrcp.f32 %v1635_v39 }
 0x409   : > { %v1699_v21 = vpop.f32.mrf.mxu1  ;;  %v1743_v22 = vpop.f32.mrf.mxu0 }
 0x40a   : > { %v1848_v51 = vmul.f32 %v2657_v50, %v1743_v22  ;;  %v1846_v12 = vmul.f32 %v2659_v35, %v1699_v21 }
 0x40b   : > { %v2483_v25 = vpop.f32.mrf.mxu1  ;;  %v2489_v26 = vpop.f32.mrf.mxu0 }
 0x40d   : > { %v1702_v34 = vpop.f32.mrf.mxu1  ;;  %v1746_v27 = vpop.f32.mrf.mxu0 }
 0x40f   : > { %v2484_v29 = vpop.f32.mrf.mxu1  ;;  %v2490_v30 = vpop.f32.mrf.mxu0 }
 0x410   : > { %v2663_v52 = vpop.eup %2662 }
 0x411   : > { %v1831_v33 = vpop.f32.mrf.mxu0  ;;  %v2665_v42 = vpop.eup %2664 }
 0x412   : > { %v1852_v49 = vmul.f32 %v2655_v48, %v1831_v33  ;;  %v2667_v61 = vpop.eup %2666  ;;  %v1849_v62 = vmul.f32 %v2665_v42, %v1746_v27 }
 0x413   : > { %v2501_v15 = vpop.f32.mrf.mxu0  ;;  %v2669_v2 = vpop.eup %2668 }
 0x414   : > { %v1870_v37 = vcombine.low %v1848_v51, %v1852_v49  ;;  %v1871_v9 = vcombine.high %v1848_v51, %v1852_v49  ;;  %v1847_v4 = vmul.f32 %v2669_v2, %v1702_v34 }
 0x415   : > { %v1834_v36 = vpop.f32.mrf.mxu0 }
 0x416   : > { %v1853_v58 = vmul.f32 %v2663_v52, %v1834_v36  ;;  %v1878_v55 = vrot.slane %v1870_v37, %v3128_v31  ;;  %v1885_v54 = vrot.slane %v1871_v9, %v3128_v31  ;;  %v2632_v9 = vld [vmem:[#allocation8 + $0x8] sm:$0xff]  }
 0x417   : > { %v2502_v43 = vpop.f32.mrf.mxu0  ;;  %2504 = vmatpush3.bf16.msra.mxu1 %v2632_v9 }
 0x418   : > { %v1938_v53 = vcombine.low %v1849_v62, %v1853_v58  ;;  %v1939_v5 = vcombine.high %v1849_v62, %v1853_v58  ;;  %2505 = vmatprep.subr.bf16.mxu1 %v2862_v1 }
 0x41a   : > { %v1946_v21 = vrot.slane %v1938_v53, %v3128_v31  ;;  %v1953_v22 = vrot.slane %v1939_v5, %v3128_v31 }
 0x435   : > { %v1787_v24 = vpop.f32.mrf.mxu1 }
 0x436   : > { %v1850_v57 = vmul.f32 %v2661_v23, %v1787_v24 }
 0x437   : > { %v2495_v40 = vpop.f32.mrf.mxu1 }
 0x438   : > { %v1854_v59 = vcombine.low %v1846_v12, %v1850_v57  ;;  %v1855_v60 = vcombine.high %v1846_v12, %v1850_v57 }
 0x439   : > { %v1790_v56 = vpop.f32.mrf.mxu1 }
 0x43a   : > { %v1862_v63 = vrot.slane %v1854_v59, %v3128_v31  ;;  %v1869_v0 = vrot.slane %v1855_v60, %v3128_v31  ;;  %v1851_v3 = vmul.f32 %v2667_v61, %v1790_v56 }
 0x43b   : > { %v2496_v6 = vpop.f32.mrf.mxu1 }
 0x43c   : > { %v1886_v7 = vcombine.low %v1862_v63, %v1878_v55  ;;  %v1887_v8 = vcombine.high %v1862_v63, %v1878_v55  ;;  %v1902_v10 = vcombine.low %v1869_v0, %v1885_v54  ;;  %v1903_v28 = vcombine.high %v1869_v0, %v1885_v54 }
 0x43d   : > { %v1922_v11 = vcombine.low %v1847_v4, %v1851_v3  ;;  %v1923_v13 = vcombine.high %v1847_v4, %v1851_v3  ;;  %v2633_v3 = vld [vmem:[#allocation8] sm:$0xff]  }
 0x43e   : > { %v1894_v14 = vrot.slane %v1886_v7, %v3135_v41  ;;  %v1901_v17 = vrot.slane %v1887_v8, %v3135_v41  ;;  %v1910_v18 = vrot.slane %v1902_v10, %v3135_v41  ;;  %v1917_v19 = vrot.slane %v1903_v28, %v3135_v41  ;;  %2506 = vmatpush3.bf16.msra.mxu1 %v2633_v3  ;;  %v2225_v8 = vld [vmem:[#allocation2] sm:$0x1] }
 0x43f   : > { %v1930_v25 = vrot.slane %v1922_v11, %v3128_v31  ;;  %v1937_v26 = vrot.slane %v1923_v13, %v3128_v31  ;;  %v2417_v10 = vmul.f32 -1.442695, %v2225_v8  ;;  %v2878_v13 = vmov 0  }
 0x440   : > { %v1990_v34 = vcombine.low %v1894_v14, %v1901_v17  ;;  %v2409_v27 = vcombine.high %v1894_v14, %v1901_v17  ;;  %v2006_v29 = vcombine.low %v1910_v18, %v1917_v19  ;;  %v2410_v30 = vcombine.high %v1910_v18, %v1917_v19  ;;  %2628 = vset.pattern.permute.xlu1 %v2878_v13 }
 0x441   : > { %v1954_v32 = vcombine.low %v1930_v25, %v1946_v21  ;;  %v1955_v33 = vcombine.high %v1930_v25, %v1946_v21  ;;  %v1970_v15 = vcombine.low %v1937_v26, %v1953_v22  ;;  %v1971_v36 = vcombine.high %v1937_v26, %v1953_v22  ;;  %2629 = vset.pattern.permute.xlu0 %v2878_v13 }
 0x442   : > { %v1997_v38 = vrot.slane %v1990_v34, %v3128_v31  ;;  %v2005_v39 = vrot.slane %v2409_v27, %v3128_v31  ;;  %v2013_v43 = vrot.slane %v2006_v29, %v3128_v31  ;;  %v2021_v44 = vrot.slane %v2410_v30, %v3128_v31 }
 0x443   : > { %v1962_v45 = vrot.slane %v1954_v32, %v3135_v41  ;;  %v1969_v20 = vrot.slane %v1955_v33, %v3135_v41  ;;  %v1978_v16 = vrot.slane %v1970_v15, %v3135_v41  ;;  %v1985_v47 = vrot.slane %v1971_v36, %v3135_v41 }
 0x444   : > { %v2023_v48 = vcombine.high %v1997_v38, %v2005_v39  ;;  %v2039_v49 = vcombine.high %v2013_v43, %v2021_v44  ;;  %v2022_v50 = vcombine.low %v1997_v38, %v2005_v39  ;;  %v2038_v51 = vcombine.low %v2013_v43, %v2021_v44 }
 0x445   : > { %v2058_v35 = vcombine.low %v1962_v45, %v1969_v20  ;;  %v2411_v23 = vcombine.high %v1962_v45, %v1969_v20  ;;  %v2074_v37 = vcombine.low %v1978_v16, %v1985_v47  ;;  %v2412_v24 = vcombine.high %v1978_v16, %v1985_v47  ;;  %v2413_v45 = vld [vmem:[#allocation9] ss:$0 sm:$0xff] }
 0x446   : > { %v2030_v52 = vrot.slane %v2022_v50, %v3135_v41  ;;  %v2046_v12 = vrot.slane %v2038_v51, %v3135_v41  ;;  %v2037_v59 = vrot.slane %v2023_v48, %v3135_v41  ;;  %v2053_v60 = vrot.slane %v2039_v49, %v3135_v41 }
 0x447   : > { %v2065_v57 = vrot.slane %v2058_v35, %v3128_v31  ;;  %v2073_v58 = vrot.slane %v2411_v23, %v3128_v31  ;;  %v2081_v40 = vrot.slane %v2074_v37, %v3128_v31  ;;  %v2089_v42 = vrot.slane %v2412_v24, %v3128_v31 }
 0x448   : > { %v2054_v61 = vcombine.low %v2030_v52, %v2046_v12  ;;  %v2056_v4 = vcombine.low %v2037_v59, %v2053_v60  ;;  %v2055_v5 = vcombine.high %v2030_v52, %v2046_v12  ;;  %2670 = vpow2.f32 %v2417_v10 }
 0x449   : > { %v2091_v62 = vcombine.high %v2065_v57, %v2073_v58  ;;  %v2107_v55 = vcombine.high %v2081_v40, %v2089_v42  ;;  %v2090_v56 = vcombine.low %v2065_v57, %v2073_v58  ;;  %v2106_v2 = vcombine.low %v2081_v40, %v2089_v42 }
 0x44b   : > { %v2105_v54 = vrot.slane %v2091_v62, %v3135_v41  ;;  %v2121_v63 = vrot.slane %v2107_v55, %v3135_v41  ;;  %v2098_v0 = vrot.slane %v2090_v56, %v3135_v41  ;;  %v2114_v31 = vrot.slane %v2106_v2, %v3135_v41 }
 0x44c   : > { %v2057_v41 = vcombine.high %v2037_v59, %v2053_v60 }
 0x44d   : > { %v2124_v53 = vcombine.low %v2105_v54, %v2121_v63  ;;  %v2123_v6 = vcombine.high %v2098_v0, %v2114_v31  ;;  %v2122_v7 = vcombine.low %v2098_v0, %v2114_v31  ;;  %v2125_v1 = vcombine.high %v2105_v54, %v2121_v63 }
 0x44f   : > { %v2618_v28 = vpack.i.bf16 %v2124_v53, %v2056_v4  ;;  %v2613_v11 = vpack.i.bf16 %v2123_v6, %v2055_v5  ;;  %v2623_v14 = vpack.i.bf16 %v2125_v1, %v2057_v41 }
 0x451   : > { %2619 = vrot.lane.b32.xlu0 %v2618_v28, %s2879_s27  ;;  %2614 = vrot.lane.b32.xlu1 %v2613_v11, %s2880_s10 }
 0x455   : > { %2624 = vrot.lane.b32.xlu1 %v2623_v14, %s2881_s14  ;;  %v2671_v17 = vpop.eup %2670 }
 0x456   : > { %v2229_v18 = vadd.f32 1.0, %v2671_v17 }
 0x458   : > { %2672 = vrcp.f32 %v2229_v18 }
 0x465   : > { %v2673_v19 = vpop.eup %2672 }
 0x466   : > { %v2236_v21 = vrot.slane %v2673_v19, %v3295_v46 }
 0x468   : > { %2238 = vperm.xlu1 %2628, %v2236_v21  }
 0x4c3   : > { %v2620_v22 = vpop.permute.xlu0 %2619  ;;  %v2615_v25 = vpop.permute.xlu1 %2614 }
 0x4c4   : > { %v2617_v26 = vunpack.i.h.bf16 %v2615_v25  ;;  %v2616_v34 = vunpack.i.l.bf16 %v2615_v25  ;;  %v2622_v27 = vunpack.i.h.bf16 %v2620_v22  ;;  %v2621_v29 = vunpack.i.l.bf16 %v2620_v22 }
 0x4c6   : > { %v2150_v30 = vsel %vm1392_vm2, %v2054_v61, %v2616_v34  ;;  %v2151_v32 = vsel %vm1392_vm2, %v2122_v7, %v2617_v26 }
 0x4c7   : > { %v2625_v33 = vpop.permute.xlu1 %2624  ;;  %v2152_v38 = vsel %vm1581_vm3, %v2150_v30, %v2621_v29  ;;  %v2153_v46 = vsel %vm1581_vm3, %v2151_v32, %v2622_v27 }
 0x4c8   : > { %v2627_v15 = vunpack.i.h.bf16 %v2625_v33  ;;  %v2626_v36 = vunpack.i.l.bf16 %v2625_v33 }
 0x4ca   : > { %v2155_v39 = vsel %vm2154_vm4, %v2152_v38, %v2626_v36  ;;  %v2156_v43 = vsel %vm2154_vm4, %v2153_v46, %v2627_v15 }
 0x4cb   : > { %v2157_v44 = vpack.c.bf16 %v2156_v43, %v2155_v39 }
 0x4cd   : > { %2508 = vmatmul.mubr.msk.bf16.vlgmr.msra.gmra.mxu1 %vm395_vm1, %v2157_v44 }
 0x4e3   : > { %v2239_v16 = vpop.permute.xlu1 %2238 }
 0x58d   : > { %v2218_v20 = vpop.f32.mrf.mxu1 }
 0x58e   : > { %v2219_v47 = vadd.f32 %v2413_v45, %v2218_v20 }
 0x58f   : > { %v2509_v48 = vpop.f32.mrf.mxu1 }
 0x590   : > { %v2241_v49 = vmul.f32 %v2239_v16, %v2219_v47 }
 0x591   : > { %v2221_v50 = vpop.f32.mrf.mxu1 }
 0x592   : > { %2243 = vst.msk [vmem:[%s367_s15] sm:$0xff] %vm395_vm1, %v2241_v49  ;;  %v2222_v51 = vadd.f32 %v2413_v45, %v2221_v50 }
 0x593   : > { %v2510_v35 = vpop.f32.mrf.mxu1 }
 0x594   : > { %v2242_v23 = vmul.f32 %v2239_v16, %v2222_v51 }
 0x596   : > { %2244 = vst.msk [vmem:[%s367_s15 + $0x8] sm:$0xff] %vm395_vm1, %v2242_v23 }
 0x597   : > { %2793 = shalt.err (!%p2790_p2)
}
 0x598   : > { %s2794_s13 = scalar_lea.hbm %s3414_s16, 256  ;;  %s2798_s15 = scalar_lea.hbm %s3467_s8, 512 }
 0x599   : > { %p2795_p13 = scmp.ne.s32.totalorder %s3414_s16, %s2794_s13  ;;  %p2799_p1 = scmp.lt.s32.totalorder %s3414_s16, %s3467_s8 }
 0x59a   : > { %p2800_p11 = scmp.lt.s32.totalorder %s2798_s15, %s2794_s13 }
 0x59b   : > { %p2796_p4 = pnand %p2795_p13, %p3485_p0 }
 0x59c   : > { %p2801_p6 = por %p2800_p11, %p2799_p1 }
 0x59d   : > { %p2797_p8 = pneg %p2796_p4 }
 0x59f   : > { %p2802_p12 = pnand %p2801_p6, %p2797_p8 }
 0x5a1   : > { %2805 = shalt.err (!%p2802_p12)
}
 0x5a2   : > { %s2883_s17 = smov 128  }
 0x5a3   : > { %2525 = dma.vmem_to_hbm [thread:$0]  (%p3485_p0), %s3409_s26, 256, %s3414_s16, %s2246_s20, %s2883_s17, %s2883_s17, %s2880_s10  }
 0x5a4 PF: > { %s2274_s25 = sand.u32 1, %s2840_s5   ;;  %p3486_p5 = scmp.ne.s32.totalorder %s3473_s12, 0 }
 0x5a5   : > { %p3487_p3 = scmp.ge.s32.totalorder %s2852_s9, 2  ;;  %s2275_s7 = scalar_lea.sflag [#allocation5], %s2274_s25 }
 0x5a7   : > { %p2542_p10 = pnand %p3487_p3, %p3486_p5 }
 0x5a9   : > { %p2543_p7 = pneg %p2542_p10 }
 0x5ab   : > { %2835 = dma.done.wait (%p2543_p7), %s2275_s7, 256  }
 0x5ac   : > { %2837 = vsyncadd (%p2543_p7), %s2275_s7, 4294967040  ;;  %p25_p9 = scmp.ge.s32.totalorder %s3012_s18, 4   ;;  %s3488_s5 = smov %s2844_s29 }
 0x5ad   : > { %s3489_s29 = smov %s2848_s30  ;;  %s3490_s30 = smov %s3022_s21 }
 0x5ae   : > { %s3491_s9 = smov %s3012_s18  ;;  %27 = sbr.rel (!%p25_p9) target bundleno = 10 (0xa), region = 109 }
 0x5b3   :  { %2280 = vsyncpa [#allocation4], 1 }
 0x5b4   :  { %2282 = vsyncpa [#allocation4 + $0x1], 1 }
 0x5b5   :  { %2283 = vsyncpa [#allocation7], 1 }
 0x5b6   :  { %2284 = vsyncpa [#allocation10], 1 }
 0x5b7   :  { %2285 = vsyncpa [#allocation5], 1 }
 0x5b8   :  { %2287 = vsyncpa [#allocation5 + $0x1], 1 }

</bundles_post_ra>
